<compile_context>
chip_gen: v7x
topology: tpu7x:2x2x1
jax: 0.10.0
libtpu: 0.0.40
codegen_flags: <defaults>
</compile_context>

<pallas_src>
import functools

import jax
import jax.numpy as jnp
from jax.experimental import pallas as pl
from jax.experimental.pallas import tpu as pltpu

BN_EPS = 1e-5
LANE = 128
ALIGN = 256   # feature-dim alignment: fills the 2x256x256 MXU on v6e/v7x


def _round_up(x, m):
    return (x + m - 1) // m * m


# ----------------------------------------------------------------------------
# Kernel
# ----------------------------------------------------------------------------
def _encoder_mlp_kernel(num_hidden_layers, x_ref, w_pool_ref, *refs):
    """fused(pool+proj) -> (Linear[BN folded] + ReLU)*L -> Linear -> residual.

    x_ref        : (TB, K_pad)     bf16 flattened image tile (lane-dense)
    w_pool_ref   : (K_pad, E_pad)  bf16 fused mean-pool + projection weight
    refs[:L]     : per-layer bf16 hidden weights (BN folded), (d_in, H_pad)
    refs[L]      : (H_pad, E_pad)  bf16 output weight
    refs[L+1]    : (3, E_pad)      f32  [b_enc, b_out, scale_after]
    refs[L+2]    : (L, H_pad)      f32  folded hidden biases
    refs[L+3]    : (TB, E_pad)     f32  output tile (padded lanes stay 0)
    """
    L = num_hidden_layers
    w_hidden_refs = refs[:L]
    w_out_ref = refs[L]
    vecs_e_ref = refs[L + 1]
    vecs_h_ref = refs[L + 2]
    o_ref = refs[L + 3]

    w_dtype = w_pool_ref.dtype
    vecs_e = vecs_e_ref[...]                 # (3, E_pad) f32
    vecs_h = vecs_h_ref[...]                 # (L, H_pad) f32

    # encode_image stub: mean-pool over H*W fused into the projection matmul
    # (bf16 x bf16 on the MXU, f32 accumulation) -- no f32 image copy, no XLU.
    feats = (
        jnp.dot(x_ref[...], w_pool_ref[...], preferred_element_type=jnp.float32)
        + vecs_e[0:1, :]
    )                                        # (TB, E_pad) f32

    h = feats
    for l in range(L):
        # Linear with eval-mode BatchNorm pre-folded into w/b, then ReLU.
        h = (
            jnp.dot(h.astype(w_dtype), w_hidden_refs[l][...],
                    preferred_element_type=jnp.float32)
            + vecs_h[l:l + 1, :]
        )
        h = jnp.maximum(h, 0.0)

    out = (
        jnp.dot(h.astype(w_dtype), w_out_ref[...],
                preferred_element_type=jnp.float32)
        + vecs_e[1:2, :]
    )

    # mlp_with_res: scale_after * mlp(feats) + feats
    o_ref[...] = vecs_e[2:3, :] * out + feats


# ----------------------------------------------------------------------------
# One-time parameter transform: fold BN, fuse pooling, pad per-layer, pack.
# ----------------------------------------------------------------------------
def fold_and_pad_params(params, *, image_hw, weight_dtype=jnp.bfloat16, align=ALIGN):
    w_enc = params["w_enc"]                  # (C, E)
    C, E = w_enc.shape
    hidden = params["hidden"]
    L = len(hidden)
    assert L >= 1, "mlp_after_layers must be >= 1"
    H = hidden[0]["w"].shape[1]

    E_pad = _round_up(E, align)
    H_pad = _round_up(H, align)
    K = C * image_hw
    K_pad = _round_up(K, LANE)               # lane-dense flattened image width

    def pad_mat(w, r, c):
        return jnp.pad(w, ((0, r - w.shape[0]), (0, c - w.shape[1])))

    def pad_vec(v, n):
        v = v.reshape(-1)
        return jnp.pad(v, (0, n - v.shape[0]))

    # Fuse the mean pool over H*W into the projection weight (done in f32).
    w_pool = jnp.repeat(w_enc / image_hw, image_hw, axis=0)    # (K, E)
    w_pool = pad_mat(w_pool, K_pad, E_pad)

    w_hidden, b_hidden = [], []
    for l, lp in enumerate(hidden):
        scale = lp["gamma"] / jnp.sqrt(lp["var"] + BN_EPS)     # (1, H)
        w_fold = lp["w"] * scale                               # fold BN scale
        b_fold = (lp["b"] - lp["mean"]) * scale + lp["beta"]   # fold BN shift
        d_in = E_pad if l == 0 else H_pad
        w_hidden.append(pad_mat(w_fold, d_in, H_pad).astype(weight_dtype))
        b_hidden.append(pad_vec(b_fold, H_pad))

    return {
        "embed_dim": E,
        "e_pad": E_pad,
        "h_pad": H_pad,
        "k_pad": K_pad,
        "num_hidden_layers": L,
        "w_pool": w_pool.astype(weight_dtype),                             # (K_pad, E_pad)
        "w_hidden": w_hidden,                                              # list of bf16
        "w_out": pad_mat(params["w_out"], H_pad, E_pad).astype(weight_dtype),
        "vecs_e": jnp.stack([pad_vec(params["b_enc"], E_pad),
                             pad_vec(params["b_out"], E_pad),
                             pad_vec(params["scale_after"], E_pad)]
                            ).astype(jnp.float32),                         # (3, E_pad)
        "vecs_h": jnp.stack(b_hidden).astype(jnp.float32),                 # (L, H_pad)
    }


# ----------------------------------------------------------------------------
# Wrapper
# ----------------------------------------------------------------------------
def image_encoder_mlp(images, folded, *, block_b=256, image_dtype=jnp.bfloat16):
    B, C, H, W = images.shape
    K = C * H * W
    K_pad, E_pad, H_pad = folded["k_pad"], folded["e_pad"], folded["h_pad"]
    L = folded["num_hidden_layers"]

    # Batch tile: pad B up to a tile multiple (any B works); slice afterwards.
    TB = _round_up(max(8, block_b), 8)
    B_pad = _round_up(B, TB)
    grid = (B_pad // TB,)

    # Lane-dense flattened bf16 image slab (halves the dominant image DMA).
    x = images.reshape(B, K).astype(image_dtype)
    x = jnp.pad(x, ((0, B_pad - B), (0, K_pad - K)))

    def resident(shape):
        # Constant index map -> fetched once; single-buffer to save VMEM.
        return pl.BlockSpec(shape, lambda b: (0,) * len(shape),
                            pipeline_mode=pl.Buffered(1))

    in_specs = [pl.BlockSpec((TB, K_pad), lambda b: (b, 0)),   # image tile
                resident((K_pad, E_pad))]                      # fused pool+proj weight
    for w in folded["w_hidden"]:
        in_specs.append(resident(tuple(w.shape)))              # hidden weights
    in_specs += [resident((H_pad, E_pad)),                     # output weight
                 resident((3, E_pad)),                         # b_enc / b_out / scale
                 resident((L, H_pad))]                         # hidden biases

    # Generation-aware VMEM budget from the actual block footprint.
    try:
        vmem_cap = int(pltpu.get_tpu_info().vmem_capacity_bytes)
    except Exception:
        vmem_cap = 64 << 20                                    # conservative (v7x per-TC)
    usable = vmem_cap - ((28 << 20) if vmem_cap > (96 << 20) else (8 << 20))

    w_elems = (K_pad * E_pad + sum(int(w.size) for w in folded["w_hidden"])
               + H_pad * E_pad)
    footprint = (
        2 * TB * K_pad * 2                          # image tile, double-buffered bf16
        + w_elems * 2                               # resident bf16 weights (1 buffer)
        + (3 * E_pad + L * H_pad) * 4               # resident bias/scale slabs (f32)
        + 2 * TB * E_pad * 4                        # output tile, double-buffered f32
        + TB * max(E_pad, H_pad) * (4 * 4 + 2 * 2)  # f32 feats/h/out + bf16 casts
    )
    vmem_limit = int(min(footprint + (16 << 20), usable))

    kernel = functools.partial(_encoder_mlp_kernel, L)
    out_padded = pl.pallas_call(
        kernel,
        out_shape=jax.ShapeDtypeStruct((B_pad, E_pad), jnp.float32),
        grid_spec=pltpu.PrefetchScalarGridSpec(
            num_scalar_prefetch=0,
            grid=grid,
            in_specs=in_specs,
            out_specs=pl.BlockSpec((TB, E_pad), lambda b: (b, 0)),
        ),
        compiler_params=pltpu.CompilerParams(
            dimension_semantics=("parallel",),      # v7x: shard batch over both TCs
            vmem_limit_bytes=vmem_limit,
        ),
    )(x, folded["w_pool"], *folded["w_hidden"], folded["w_out"],
      folded["vecs_e"], folded["vecs_h"])

    return out_padded[:B, : folded["embed_dim"]]


# ----------------------------------------------------------------------------
# Pure-JAX reference (mirrors the PyTorch forward, eval-mode BN, f32)
# ----------------------------------------------------------------------------
def reference(images, params):
    B, C, H, W = images.shape
    pooled = images.reshape(B, C, H * W).mean(-1)
    feats = pooled @ params["w_enc"] + params["b_enc"]
    h = feats
    for lp in params["hidden"]:
        h = h @ lp["w"] + lp["b"]
        h = (h - lp["mean"]) * (lp["gamma"] / jnp.sqrt(lp["var"] + BN_EPS)) + lp["beta"]
        h = jnp.maximum(h, 0.0)
    out = h @ params["w_out"] + params["b_out"]
    return params["scale_after"] * out + feats


def init_params(key, *, in_channels, embed_dim, mlp_after_ratio, mlp_after_layers,
                mlp_res_scale_init):
    hidden_dim = int(embed_dim * mlp_after_ratio)
    dims = [embed_dim] + [hidden_dim] * mlp_after_layers + [embed_dim]

    keys = jax.random.split(key, 4 + 6 * mlp_after_layers)
    ki = iter(range(len(keys)))

    def nrm(shape, scale=0.02):
        return (scale * jax.random.normal(keys[next(ki)], shape)).astype(jnp.float32)

    params = {
        "w_enc": nrm((in_channels, embed_dim)),
        "b_enc": nrm((1, embed_dim)),
        "hidden": [],
        "w_out": nrm((dims[-2], dims[-1])),
        "b_out": nrm((1, dims[-1])),
        "scale_after": jnp.ones((1, embed_dim), jnp.float32) * mlp_res_scale_init,
    }
    for i in range(mlp_after_layers):
        d_in, d_out = dims[i], dims[i + 1]
        params["hidden"].append({
            "w": nrm((d_in, d_out)),
            "b": nrm((1, d_out)),
            "gamma": 1.0 + nrm((1, d_out), 0.1),
            "beta": nrm((1, d_out), 0.1),
            "mean": nrm((1, d_out), 0.1),
            "var": 1.0 + jnp.abs(nrm((1, d_out), 0.1)),
        })
    return params


if __name__ == "__main__":
    # Small but pipeline-exercising shapes: B=200 with block_b=128 -> 2-step
    # batch grid plus a padded final tile (padding sliced off the output).
    B, C, H, W = 200, 4, 16, 16        # images (NCHW)
    EMBED_DIM = 32                     # model.num_features / embed_dim
    MLP_AFTER_RATIO = 2.0              # args.mlp_after_ratio
    MLP_AFTER_LAYERS = 2               # args.mlp_after_layers
    MLP_RES_SCALE_INIT = 0.1           # args.mlp_res_scale_init (mlp_with_res=True)

    root = jax.random.PRNGKey(0)
    k_img, k_par = jax.random.split(root)
    images = jax.random.normal(k_img, (B, C, H, W), dtype=jnp.float32)
    params = init_params(
        k_par,
        in_channels=C,
        embed_dim=EMBED_DIM,
        mlp_after_ratio=MLP_AFTER_RATIO,
        mlp_after_layers=MLP_AFTER_LAYERS,
        mlp_res_scale_init=MLP_RES_SCALE_INIT,
    )

    folded = fold_and_pad_params(params, image_hw=H * W)   # BN fold + pool fuse + pad
    out = image_encoder_mlp(images, folded, block_b=128)
    out = jax.block_until_ready(out)

    ref = jax.block_until_ready(reference(images, params))
    assert out.shape == (B, EMBED_DIM)
    # bf16 images/weights in the MXU path -> slightly looser tolerance.
    assert jnp.allclose(out, ref, atol=5e-3, rtol=5e-2), "mismatch vs. JAX reference"

    print("KERNEL_OK")
</pallas_src>

<mosaic_0001>
module attributes {stable_mosaic.version = 11 : i64} {
  func.func @_encoder_mlp_kernel(%arg0: i32, %arg1: memref<128x1024xbf16, #tpu.memory_space<vmem>>, %arg2: memref<1024x256xbf16, #tpu.memory_space<vmem>>, %arg3: memref<256x256xbf16, #tpu.memory_space<vmem>>, %arg4: memref<256x256xbf16, #tpu.memory_space<vmem>>, %arg5: memref<256x256xbf16, #tpu.memory_space<vmem>>, %arg6: memref<3x256xf32, #tpu.memory_space<vmem>>, %arg7: memref<2x256xf32, #tpu.memory_space<vmem>>, %arg8: memref<128x256xf32, #tpu.memory_space<vmem>>) attributes {dimension_semantics = [#tpu.dimension_semantics<parallel>], iteration_bounds = array<i64: 2>, scalar_prefetch = 0 : i64, scratch_operands = 0 : i64, tpu.core_type = #tpu.core_type<tc>, window_params = [{transform_indices = @transform_0, window_bounds = array<i64: 128, 1024>}, {pipeline_mode = #tpu.pipeline_mode<synchronous>, transform_indices = @transform_1, window_bounds = array<i64: 1024, 256>}, {pipeline_mode = #tpu.pipeline_mode<synchronous>, transform_indices = @transform_2, window_bounds = array<i64: 256, 256>}, {pipeline_mode = #tpu.pipeline_mode<synchronous>, transform_indices = @transform_3, window_bounds = array<i64: 256, 256>}, {pipeline_mode = #tpu.pipeline_mode<synchronous>, transform_indices = @transform_4, window_bounds = array<i64: 256, 256>}, {pipeline_mode = #tpu.pipeline_mode<synchronous>, transform_indices = @transform_5, window_bounds = array<i64: 3, 256>}, {pipeline_mode = #tpu.pipeline_mode<synchronous>, transform_indices = @transform_6, window_bounds = array<i64: 2, 256>}, {transform_indices = @transform_7, window_bounds = array<i64: 128, 256>}]} {
    %c0 = arith.constant 0 : index
    %c0_0 = arith.constant 0 : index
    %0 = vector.load %arg6[%c0, %c0_0] : memref<3x256xf32, #tpu.memory_space<vmem>>, vector<3x256xf32>
    %c0_1 = arith.constant 0 : index
    %c0_2 = arith.constant 0 : index
    %1 = vector.load %arg7[%c0_1, %c0_2] : memref<2x256xf32, #tpu.memory_space<vmem>>, vector<2x256xf32>
    %c0_3 = arith.constant 0 : index
    %c0_4 = arith.constant 0 : index
    %2 = vector.load %arg1[%c0_3, %c0_4] : memref<128x1024xbf16, #tpu.memory_space<vmem>>, vector<128x1024xbf16>
    %c0_5 = arith.constant 0 : index
    %c0_6 = arith.constant 0 : index
    %3 = vector.load %arg2[%c0_5, %c0_6] : memref<1024x256xbf16, #tpu.memory_space<vmem>>, vector<1024x256xbf16>
    %cst = arith.constant dense<0.000000e+00> : vector<128x256xf32>
    %4 = tpu.matmul %2, %3, %cst {dimension_numbers = #tpu.dot_dimension_numbers<[1], [0], [0], [1], [0, 0, 1, 1], [], []>} : vector<128x1024xbf16>, vector<1024x256xbf16>, vector<128x256xf32> -> vector<128x256xf32>
    %5 = vector.extract_strided_slice %0 {offsets = [0, 0], sizes = [1, 256], strides = [1, 1]} : vector<3x256xf32> to vector<1x256xf32>
    %6 = vector.broadcast %5 : vector<1x256xf32> to vector<128x256xf32>
    %7 = arith.addf %4, %6 : vector<128x256xf32>
    %8 = arith.truncf %7 : vector<128x256xf32> to vector<128x256xbf16>
    %c0_7 = arith.constant 0 : index
    %c0_8 = arith.constant 0 : index
    %9 = vector.load %arg3[%c0_7, %c0_8] : memref<256x256xbf16, #tpu.memory_space<vmem>>, vector<256x256xbf16>
    %cst_9 = arith.constant dense<0.000000e+00> : vector<128x256xf32>
    %10 = tpu.matmul %8, %9, %cst_9 {dimension_numbers = #tpu.dot_dimension_numbers<[1], [0], [0], [1], [0, 0, 1, 1], [], []>} : vector<128x256xbf16>, vector<256x256xbf16>, vector<128x256xf32> -> vector<128x256xf32>
    %11 = vector.extract_strided_slice %1 {offsets = [0, 0], sizes = [1, 256], strides = [1, 1]} : vector<2x256xf32> to vector<1x256xf32>
    %12 = vector.broadcast %11 : vector<1x256xf32> to vector<128x256xf32>
    %13 = arith.addf %10, %12 : vector<128x256xf32>
    %cst_10 = arith.constant 0.000000e+00 : f32
    %14 = vector.broadcast %cst_10 : f32 to vector<128x256xf32>
    %15 = arith.maximumf %13, %14 : vector<128x256xf32>
    %16 = arith.truncf %15 : vector<128x256xf32> to vector<128x256xbf16>
    %c0_11 = arith.constant 0 : index
    %c0_12 = arith.constant 0 : index
    %17 = vector.load %arg4[%c0_11, %c0_12] : memref<256x256xbf16, #tpu.memory_space<vmem>>, vector<256x256xbf16>
    %cst_13 = arith.constant dense<0.000000e+00> : vector<128x256xf32>
    %18 = tpu.matmul %16, %17, %cst_13 {dimension_numbers = #tpu.dot_dimension_numbers<[1], [0], [0], [1], [0, 0, 1, 1], [], []>} : vector<128x256xbf16>, vector<256x256xbf16>, vector<128x256xf32> -> vector<128x256xf32>
    %19 = vector.extract_strided_slice %1 {offsets = [1, 0], sizes = [1, 256], strides = [1, 1]} : vector<2x256xf32> to vector<1x256xf32>
    %20 = vector.broadcast %19 : vector<1x256xf32> to vector<128x256xf32>
    %21 = arith.addf %18, %20 : vector<128x256xf32>
    %cst_14 = arith.constant 0.000000e+00 : f32
    %22 = vector.broadcast %cst_14 : f32 to vector<128x256xf32>
    %23 = arith.maximumf %21, %22 : vector<128x256xf32>
    %24 = arith.truncf %23 : vector<128x256xf32> to vector<128x256xbf16>
    %c0_15 = arith.constant 0 : index
    %c0_16 = arith.constant 0 : index
    %25 = vector.load %arg5[%c0_15, %c0_16] : memref<256x256xbf16, #tpu.memory_space<vmem>>, vector<256x256xbf16>
    %cst_17 = arith.constant dense<0.000000e+00> : vector<128x256xf32>
    %26 = tpu.matmul %24, %25, %cst_17 {dimension_numbers = #tpu.dot_dimension_numbers<[1], [0], [0], [1], [0, 0, 1, 1], [], []>} : vector<128x256xbf16>, vector<256x256xbf16>, vector<128x256xf32> -> vector<128x256xf32>
    %27 = vector.extract_strided_slice %0 {offsets = [1, 0], sizes = [1, 256], strides = [1, 1]} : vector<3x256xf32> to vector<1x256xf32>
    %28 = vector.broadcast %27 : vector<1x256xf32> to vector<128x256xf32>
    %29 = arith.addf %26, %28 : vector<128x256xf32>
    %30 = vector.extract_strided_slice %0 {offsets = [2, 0], sizes = [1, 256], strides = [1, 1]} : vector<3x256xf32> to vector<1x256xf32>
    %31 = vector.broadcast %30 : vector<1x256xf32> to vector<128x256xf32>
    %32 = arith.mulf %31, %29 : vector<128x256xf32>
    %33 = arith.addf %32, %7 : vector<128x256xf32>
    %c0_18 = arith.constant 0 : index
    %c0_19 = arith.constant 0 : index
    %34 = vector.load %arg8[%c0_18, %c0_19] : memref<128x256xf32, #tpu.memory_space<vmem>>, vector<128x256xf32>
    tpu.vector_store %arg8[%c0_18, %c0_19], %33 {strides = array<i32>} : memref<128x256xf32, #tpu.memory_space<vmem>>, vector<128x256xf32>,
    return
  }
  func.func @transform_0(%arg0: i32) -> (i32, i32) {
    %c0_i32 = arith.constant 0 : i32
    %c0_i32_0 = arith.constant 0 : i32
    return %arg0, %c0_i32 : i32, i32
  }
  func.func @transform_1(%arg0: i32) -> (i32, i32) {
    %c0_i32 = arith.constant 0 : i32
    %c0_i32_0 = arith.constant 0 : i32
    %c0_i32_1 = arith.constant 0 : i32
    return %c0_i32, %c0_i32_0 : i32, i32
  }
  func.func @transform_2(%arg0: i32) -> (i32, i32) {
    %c0_i32 = arith.constant 0 : i32
    %c0_i32_0 = arith.constant 0 : i32
    %c0_i32_1 = arith.constant 0 : i32
    return %c0_i32, %c0_i32_0 : i32, i32
  }
  func.func @transform_3(%arg0: i32) -> (i32, i32) {
    %c0_i32 = arith.constant 0 : i32
    %c0_i32_0 = arith.constant 0 : i32
    %c0_i32_1 = arith.constant 0 : i32
    return %c0_i32, %c0_i32_0 : i32, i32
  }
  func.func @transform_4(%arg0: i32) -> (i32, i32) {
    %c0_i32 = arith.constant 0 : i32
    %c0_i32_0 = arith.constant 0 : i32
    %c0_i32_1 = arith.constant 0 : i32
    return %c0_i32, %c0_i32_0 : i32, i32
  }
  func.func @transform_5(%arg0: i32) -> (i32, i32) {
    %c0_i32 = arith.constant 0 : i32
    %c0_i32_0 = arith.constant 0 : i32
    %c0_i32_1 = arith.constant 0 : i32
    return %c0_i32, %c0_i32_0 : i32, i32
  }
  func.func @transform_6(%arg0: i32) -> (i32, i32) {
    %c0_i32 = arith.constant 0 : i32
    %c0_i32_0 = arith.constant 0 : i32
    %c0_i32_1 = arith.constant 0 : i32
    return %c0_i32, %c0_i32_0 : i32, i32
  }
  func.func @transform_7(%arg0: i32) -> (i32, i32) {
    %c0_i32 = arith.constant 0 : i32
    %c0_i32_0 = arith.constant 0 : i32
    return %arg0, %c0_i32 : i32, i32
  }
}

</mosaic_0001>

<bundles_post_ra>
// kernel: tpu_custom_call.1
= control target key start
LH: loop header
LB: loop body
LE: loop exit
PB: predicated region body
PF: predicated region fallthrough
CT: control target
= control target key end

     0   :  { %12 = vsyncpa [#allocation3], 0  ;;  %s5198_s0 = inlined_call_operand.hbm [shape: bf16[256,1024], index: 0, kind: input, shape index: {}]   ;;  %s5199_s1 = inlined_call_operand.hbm [shape: bf16[1024,256], index: 1, kind: input, shape index: {}]   ;;  %s5200_s2 = inlined_call_operand.hbm [shape: bf16[256,256], index: 2, kind: input, shape index: {}]   ;;  %s5201_s3 = inlined_call_operand.hbm [shape: bf16[256,256], index: 3, kind: input, shape index: {}]   ;;  %s5202_s4 = inlined_call_operand.hbm [shape: bf16[256,256], index: 4, kind: input, shape index: {}]   ;;  %s5203_s5 = inlined_call_operand.vmem [shape: f32[3,256], index: 5, kind: input, shape index: {}]   ;;  %s5204_s6 = inlined_call_operand.vmem [shape: f32[2,256], index: 6, kind: input, shape index: {}]   ;;  %s5205_s7 = inlined_call_operand.hbm [shape: f32[256,256], index: 7, kind: output, shape index: {}]  }
   0x1   :  { %14 = vsyncpa [#allocation3 + $0x1], 0 }
   0x2   :  { %15 = vsyncpa [#allocation6], 0 }
   0x3   :  { %16 = vsyncpa [#allocation9], 0 }
   0x4   :  { %17 = vsyncpa [#allocation4], 0 }
   0x5   :  { %19 = vsyncpa [#allocation4 + $0x1], 0  ;;  %s4448_s24 = smov 0   ;;  %s4450_s25 = smov 0  }
   0x6   :  { %s4452_s26 = smov 0   ;;  %s4454_s27 = smov 0  }
   0x7 LB: > { %s4469_s28 = sadd.s32 4294967295, %s4394_s27   ;;  %s3305_s29 = sadd.s32 4294967294, %s4394_s27   ;;  %s4394_s27 = sphi %s4454_s27, %s5231_s27   ;;  %s4390_s26 = sphi %s4452_s26, %s5230_s26   ;;  %s4386_s25 = sphi %s4450_s25, %s5229_s25   ;;  %s4382_s24 = sphi %s4448_s24, %s5228_s24  }
   0x8   : > { %p45_p0 = scmp.ne.s32.totalorder %s4386_s25, %s4382_s24  ;;  %p5206_p1 = scmp.eq.s32.totalorder %s4469_s28, 0 }
   0x9   : > { %p201_p3 = scmp.eq.s32.totalorder %s3305_s29, 1  ;;  %p3306_p5 = scmp.ge.s32.totalorder %s4394_s27, 1 }
   0xa   : > { %p4478_p4 = por %p5206_p1, %p45_p0  ;;  %p208_p7 = scmp.lt.s32.totalorder %s4394_s27, 3 }
   0xb   : > { %p4483_p6 = por %p201_p3, %p45_p0  ;;  %s4396_s10 = smov [#allocation5]  }
   0xc   : > { %s5210_s30 = scalar_select %p4478_p4, 1, 0 }
   0xd   : > { %s5211_s8 = scalar_select %p4483_p6, 1, 0 }
   0xe   : > { %p4488_p8 = pnand %p3306_p5, %p208_p7  ;;  %s220_s11 = sshll.u32 %s4396_s10, 4  ;;  %s4492_s11 = int_to_ptr.vmem [resolvable:$true] %s220_s11 }
   0xf   : > { %5212 = sst [smem:[#allocation16_spill]] %s5211_s8  ;;  %s4397_s13 = smov [#allocation8]  }
  0x10   : > { %s5213_s9 = scalar_select %p4488_p8, 1, 0 }
  0x11   : > { %p3769_p9 = pneg %p4488_p8  ;;  %s246_s14 = sshll.u32 %s4397_s13, 4  ;;  %s4503_s14 = int_to_ptr.vmem [resolvable:$true] %s246_s14 }
  0x12   : > { %s4398_s15 = smov [#allocation7]   ;;  %s4178_s19 = scalar_lea.hbm %s5199_s1, 16384 }
  0x13   : > { %p4499_p11 = pnand %p3769_p9, %p5206_p1  ;;  %s4505_s16 = sshll.u32 %s4398_s15, 4  ;;  %s234_s16 = int_to_ptr.vmem [resolvable:$true] %s4505_s16 }
  0x14   : > { %p4179_p12 = scmp.ne.s32.totalorder %s5199_s1, %s4178_s19  ;;  %p4185_p5 = scmp.lt.u32.totalorder %s4178_s19, %s5199_s1 }
  0x15   : > { %p4515_p13 = pneg %p4499_p11 }
  0x17   : > { %p4181_p0 = pnand %p4515_p13, %p4179_p12 }
  0x19   : > { %p4182_p3 = pneg %p4181_p0 }
  0x1b   : > { %p4187_p7 = pnand %p4185_p5, %p4182_p3 }
  0x1d   : > { %4190 = shalt.err (!%p4187_p7)
}
  0x1e   : > { %s4191_s10 = scalar_lea.vmem %s4492_s11, 16384  ;;  %p4199_p2 = scmp.lt.s32.totalorder %s4492_s11, %s4492_s11 }
  0x1f   : > { %p4192_p9 = scmp.ne.s32.totalorder %s4492_s11, %s4191_s10  ;;  %p4200_p6 = scmp.lt.s32.totalorder %s4191_s10, %s4191_s10 }
  0x21   : > { %p4194_p10 = pnand %p4192_p9, %p4515_p13  ;;  %p4201_p12 = por %p4200_p6, %p4199_p2 }
  0x23   : > { %p4195_p1 = pneg %p4194_p10 }
  0x25   : > { %p4202_p0 = pnand %p4201_p12, %p4195_p1 }
  0x27   : > { %4205 = shalt.err (!%p4202_p0)
}
  0x28   : > { %s4399_s13 = smov 128   ;;  %s4400_s15 = smov 8  }
  0x29   : > { %3772 = dma.hbm_to_vmem [thread:$0]  (!%p4499_p11), %s5199_s1, 16384, %s4492_s11, [#allocation6], %s4399_s13, %s4399_s13, %s4400_s15  }
  0x2a   : > { %s4206_s21 = scalar_lea.hbm %s5201_s3, 4096 }
  0x2b   : > { %p4207_p1 = scmp.ne.s32.totalorder %s5201_s3, %s4206_s21  ;;  %p4213_p10 = scmp.lt.u32.totalorder %s4206_s21, %s5201_s3 }
  0x2d   : > { %p4209_p2 = pnand %p4207_p1, %p4515_p13 }
  0x2f   : > { %p4210_p6 = pneg %p4209_p2 }
  0x31   : > { %p4215_p3 = pnand %p4213_p10, %p4210_p6 }
  0x33   : > { %4218 = shalt.err (!%p4215_p3)
}
  0x34   : > { %s4219_s11 = scalar_lea.vmem %s4503_s14, 4096  ;;  %p4227_p12 = scmp.lt.s32.totalorder %s4503_s14, %s4503_s14 }
  0x35   : > { %p4220_p5 = scmp.ne.s32.totalorder %s4503_s14, %s4219_s11  ;;  %p4228_p0 = scmp.lt.s32.totalorder %s4219_s11, %s4219_s11 }
  0x37   : > { %p4222_p7 = pnand %p4220_p5, %p4515_p13  ;;  %p4229_p1 = por %p4228_p0, %p4227_p12 }
  0x39   : > { %p4223_p9 = pneg %p4222_p7 }
  0x3b   : > { %p4230_p2 = pnand %p4229_p1, %p4223_p9 }
  0x3d   : > { %4233 = shalt.err (!%p4230_p2)
}
  0x3e   : > { %3778 = dma.hbm_to_vmem [thread:$0]  (!%p4499_p11), %s5201_s3, 4096, %s4503_s14, [#allocation9], %s4399_s13, %s4399_s13, %s4400_s15  }
  0x3f   : > { %s4234_s20 = scalar_lea.hbm %s5200_s2, 4096 }
  0x40   : > { %p4235_p6 = scmp.ne.s32.totalorder %s5200_s2, %s4234_s20  ;;  %p4241_p5 = scmp.lt.u32.totalorder %s4234_s20, %s5200_s2 }
  0x42   : > { %p4237_p10 = pnand %p4235_p6, %p4515_p13 }
  0x44   : > { %p4238_p3 = pneg %p4237_p10 }
  0x46   : > { %p4243_p7 = pnand %p4241_p5, %p4238_p3 }
  0x48   : > { %4246 = shalt.err (!%p4243_p7)
}
  0x49   : > { %s4247_s11 = scalar_lea.vmem %s234_s16, 4096  ;;  %p4255_p1 = scmp.lt.s32.totalorder %s234_s16, %s234_s16 }
  0x4a   : > { %p4248_p9 = scmp.ne.s32.totalorder %s234_s16, %s4247_s11  ;;  %p4256_p2 = scmp.lt.s32.totalorder %s4247_s11, %s4247_s11 }
  0x4c   : > { %p4250_p12 = pnand %p4248_p9, %p4515_p13  ;;  %p4257_p4 = por %p4256_p2, %p4255_p1 }
  0x4e   : > { %p4251_p0 = pneg %p4250_p12 }
  0x50   : > { %p4258_p8 = pnand %p4257_p4, %p4251_p0 }
  0x52   : > { %4261 = shalt.err (!%p4258_p8)
}
  0x53   : > { %3775 = dma.hbm_to_vmem [thread:$0]  (!%p4499_p11), %s5200_s2, 4096, %s234_s16, [#allocation6], %s4399_s13, %s4399_s13, %s4400_s15  }
  0x54   : > { %s4401_s17 = smov [#allocation10]   ;;  %s4262_s21 = scalar_lea.hbm %s5202_s4, 4096 }
  0x55   : > { %s259_s18 = sshll.u32 %s4401_s17, 4  ;;  %p4263_p4 = scmp.ne.s32.totalorder %s5202_s4, %s4262_s21  ;;  %s260_s18 = int_to_ptr.vmem [resolvable:$true] %s259_s18 }
  0x56   : > { %p4269_p10 = scmp.lt.u32.totalorder %s4262_s21, %s5202_s4 }
  0x57   : > { %p4265_p8 = pnand %p4263_p4, %p4515_p13 }
  0x59   : > { %p4266_p6 = pneg %p4265_p8 }
  0x5b   : > { %p4271_p3 = pnand %p4269_p10, %p4266_p6 }
  0x5d   : > { %4274 = shalt.err (!%p4271_p3)
}
  0x5e   : > { %s4275_s16 = scalar_lea.vmem %s260_s18, 4096  ;;  %p4283_p12 = scmp.lt.s32.totalorder %s260_s18, %s260_s18 }
  0x5f   : > { %p4276_p5 = scmp.ne.s32.totalorder %s260_s18, %s4275_s16  ;;  %p4284_p0 = scmp.lt.s32.totalorder %s4275_s16, %s4275_s16 }
  0x61   : > { %p4278_p7 = pnand %p4276_p5, %p4515_p13  ;;  %p4285_p1 = por %p4284_p0, %p4283_p12 }
  0x63   : > { %p4279_p9 = pneg %p4278_p7 }
  0x65   : > { %p4286_p2 = pnand %p4285_p1, %p4279_p9 }
  0x67   : > { %4289 = shalt.err (!%p4286_p2)
}
  0x68   : > { %3781 = dma.hbm_to_vmem [thread:$0]  (!%p4499_p11), %s5202_s4, 4096, %s260_s18, [#allocation9], %s4399_s13, %s4399_s13, %s4400_s15  }
  0x69   : > { %s4609_s22 = sadd.s32 1, %s4394_s27   ;;  %s32_s12 = sadd.s32 1, %s4390_s26 }
  0x6a   : > { %s29_s17 = ssub.s32 %s4394_s27, %s4609_s22  ;;  %p39_p13 = scmp.ne.s32.totalorder %s4390_s26, %s4386_s25 }
  0x6b   : > { %p30_p4 = scmp.eq.s32.totalorder %s29_s17, 0  ;;  %p40_p8 = scmp.eq.s32.totalorder %s4394_s27, 0 }
  0x6c   : > { %p5216_p6 = scmp.eq.s32.totalorder %s4469_s28, 1  ;;  %p3794_p3 = scmp.lt.s32.totalorder %s4394_s27, 2 }
  0x6d   : > { %s4625_s20 = scalar_select %p30_p4, %s4390_s26, %s32_s12  }
  0x6e   : > { %p4619_p10 = por %p5216_p6, %p39_p13  ;;  %p41_p5 = por %p40_p8, %p39_p13 }
  0x6f   : > { %s279_s21 = sand.u32 1, %s4390_s26   ;;  %s3618_s13 = sshll.u32 %s4394_s27, 13 }
  0x70   : > { %s3312_s23 = sshll.u32 %s279_s21, 9  ;;  %s4632_s29 = scalar_lea.hbm %s5198_s0, %s3618_s13 }
  0x71   : > { %s283_s10 = scalar_lea.vmem [#allocation2], %s3312_s23  ;;  %p4636_p11 = pnand %p3794_p3, %p41_p5 }
  0x72   : > { %s291_s11 = sshll.u32 %s283_s10, 4  ;;  %s4640_s14 = scalar_lea.sflag [#allocation3], %s279_s21  ;;  %s4634_s11 = int_to_ptr.vmem [resolvable:$true] %s291_s11 }
  0x73   : > { %s4290_s8 = scalar_lea.hbm %s4632_s29, 8192  ;;  %p4292_p9 = pneg %p4636_p11 }
  0x74   : > { %p4291_p7 = scmp.ne.s32.totalorder %s4632_s29, %s4290_s8  ;;  %s4295_s23 = scalar_lea.hbm %s5198_s0, 16384 }
  0x75   : > { %p4296_p1 = scmp.lt.u32.totalorder %s4632_s29, %s5198_s0  ;;  %p4297_p2 = scmp.lt.u32.totalorder %s4295_s23, %s4290_s8 }
  0x76   : > { %p4293_p12 = pnand %p4292_p9, %p4291_p7  ;;  %p4299_p4 = scmp.lt.u32.totalorder %s4290_s8, %s4632_s29 }
  0x77   : > { %p4298_p13 = por %p4297_p2, %p4296_p1 }
  0x78   : > { %p4294_p0 = pneg %p4293_p12 }
  0x79   : > { %p4300_p8 = por %p4299_p4, %p4298_p13 }
  0x7b   : > { %p4301_p6 = pnand %p4300_p8, %p4294_p0 }
  0x7d   : > { %4304 = shalt.err (!%p4301_p6)
}
  0x7e   : > { %s4305_s21 = scalar_lea.vmem %s4634_s11, 8192  ;;  %s4402_s18 = smov [#allocation2]  }
  0x7f   : > { %p4306_p3 = scmp.ne.s32.totalorder %s4634_s11, %s4305_s21  ;;  %s4310_s10 = sshll.u32 %s4402_s18, 4  ;;  %s4311_s10 = int_to_ptr.vmem [resolvable:$false] %s4310_s10 }
  0x80   : > { %s4312_s12 = scalar_lea.vmem %s4311_s10, 16384  ;;  %p4313_p12 = scmp.lt.s32.totalorder %s4634_s11, %s4311_s10 }
  0x81   : > { %p4308_p5 = pnand %p4306_p3, %p4292_p9  ;;  %p4314_p1 = scmp.lt.s32.totalorder %s4312_s12, %s4305_s21 }
  0x83   : > { %p4309_p7 = pneg %p4308_p5  ;;  %p4315_p2 = por %p4314_p1, %p4313_p12 }
  0x85   : > { %p4316_p13 = pnand %p4315_p2, %p4309_p7 }
  0x87   : > { %4319 = shalt.err (!%p4316_p13)
}
  0x88   : > { %s4403_s8 = smov 512   ;;  %s4404_s17 = smov 32  }
  0x89   : > { %3785 = dma.hbm_to_vmem [thread:$0]  (!%p4636_p11), %s4632_s29, 8192, %s4634_s11, %s4640_s14, %s4403_s8, %s4403_s8, %s4404_s17  }
  0x8a   : > { %p5219_p9 = scmp.ne.s32.totalorder %s5213_s9, 0 }
  0x8b   : > { %s4671_s23 = sand.u32 (!%p5219_p9), 1, %s4386_s25   ;;  %p5220_p0 = scmp.ne.s32.totalorder (!%p5219_p9), %s5210_s30, 0 }
  0x8c   : > { %303 = sbr.rel (%p5219_p9) target bundleno = 1368 (0x558), region = 48  ;;  %s3317_s13 = sshll.u32 (!%p5219_p9), %s4671_s23, 9 }
  0x8d   : > { %s306_s15 = scalar_lea.sflag (!%p5219_p9), [#allocation3], %s4671_s23  ;;  %s4675_s21 = scalar_lea.vmem (!%p5219_p9), [#allocation2], %s3317_s13 }
  0x93   : > { %4365 = dma.done.wait (%p5220_p0), %s306_s15, 8192  }
  0x94   : > { %4367 = vsyncadd (%p5220_p0), %s306_s15, 4294959104  ;;  %p5221_p11 = scmp.eq.s32.totalorder %s4469_s28, 0 }
  0x96   : > { %4369 = dma.done.wait (%p5221_p11), [#allocation6], 20480   ;;  %p5222_p4 = pmov %p5221_p11 }
  0x98   : > { %4371 = vsyncadd (%p5222_p4), [#allocation6], 4294946816  ;;  %p5223_p8 = pmov %p5222_p4 }
  0x99   : > { %p5224_p6 = pmov %p5222_p4 }
  0x9a   : > { %4373 = dma.done.wait (%p5223_p8), [#allocation9], 8192  }
  0x9b   : > { %4375 = vsyncadd (%p5224_p6), [#allocation9], 4294959104  ;;  %v3842_v0 = vld [vmem:[#allocation5 + $0x4] ss:$8 sps:$4 sm:$0xff]   ;;  %v3844_v1 = vld [vmem:[#allocation5] ss:$8 sps:$4 sm:$0xff]  }
  0x9c   : > { %1531 = vmatprep.subr.bf16.mxu0 %v3842_v0  ;;  %v3845_v2 = vld [vmem:[#allocation5 + $0x14] ss:$8 sps:$4 sm:$0xff]   ;;  %v3847_v3 = vld [vmem:[#allocation5 + $0x10] ss:$8 sps:$4 sm:$0xff]   ;;  %v3848_v4 = vld [vmem:[#allocation5 + $0x24] ss:$8 sps:$4 sm:$0xff]  }
  0x9d   : > { %1532 = vmatpush1.bf16.msra.mxu0 %v3844_v1  ;;  %v3850_v5 = vld [vmem:[#allocation5 + $0x20] ss:$8 sps:$4 sm:$0xff]   ;;  %v3851_v6 = vld [vmem:[#allocation5 + $0x34] ss:$8 sps:$4 sm:$0xff]   ;;  %v3853_v7 = vld [vmem:[#allocation5 + $0x30] ss:$8 sps:$4 sm:$0xff]  }
  0x9e   : > { %1533 = vmatprep.subr.bf16.mxu0 %v3845_v2  ;;  %v3854_v8 = vld [vmem:[#allocation5 + $0x44] ss:$8 sps:$4 sm:$0xff]   ;;  %v3856_v9 = vld [vmem:[#allocation5 + $0x40] ss:$8 sps:$4 sm:$0xff]   ;;  %v3857_v10 = vld [vmem:[#allocation5 + $0x54] ss:$8 sps:$4 sm:$0xff]  }
  0x9f   : > { %v3859_v11 = vld [vmem:[#allocation5 + $0x50] ss:$8 sps:$4 sm:$0xff]   ;;  %v3860_v12 = vld [vmem:[#allocation5 + $0x64] ss:$8 sps:$4 sm:$0xff]   ;;  %v3862_v16 = vld [vmem:[#allocation5 + $0x60] ss:$8 sps:$4 sm:$0xff]  }
  0xa0   : > { %v360_v13 = vld [vmem:[%s4675_s21] sm:$0xff]  ;;  %v3863_v17 = vld [vmem:[#allocation5 + $0x74] ss:$8 sps:$4 sm:$0xff]   ;;  %v3865_v18 = vld [vmem:[#allocation5 + $0x70] ss:$8 sps:$4 sm:$0xff]   ;;  %s3322_s16 = sshll.u32 %s4671_s23, 8 }
  0xa1   : > { %1534 = vmatpush1.bf16.msra.mxu0 %v3847_v3  ;;  %v364_v14 = vld [vmem:[%s4675_s21 + $0x20] sm:$0xff]  ;;  %v3869_v21 = vld [vmem:[#allocation5 + $0x94] ss:$8 sps:$4 sm:$0xff]   ;;  %v3871_v22 = vld [vmem:[#allocation5 + $0x90] ss:$8 sps:$4 sm:$0xff]   ;;  %s5027_s14 = scalar_lea.vmem [#allocation11], %s3322_s16 }
  0xa2   : > { %1535 = vmatprep.subr.bf16.mxu0 %v3848_v4  ;;  %v3324_v15 = vcombine.high %v360_v13, %v364_v14  ;;  %v3866_v19 = vld [vmem:[#allocation5 + $0x84] ss:$8 sps:$4 sm:$0xff]   ;;  %v3868_v20 = vld [vmem:[#allocation5 + $0x80] ss:$8 sps:$4 sm:$0xff]   ;;  %v3875_v25 = vld [vmem:[#allocation5 + $0xb4] ss:$8 sps:$4 sm:$0xff]   ;;  %v3323_v38 = vcombine.low %v360_v13, %v364_v14 }
  0xa3   : > { %v3872_v23 = vld [vmem:[#allocation5 + $0xa4] ss:$8 sps:$4 sm:$0xff]   ;;  %v3874_v24 = vld [vmem:[#allocation5 + $0xa0] ss:$8 sps:$4 sm:$0xff]   ;;  %v3877_v26 = vld [vmem:[#allocation5 + $0xb0] ss:$8 sps:$4 sm:$0xff]  }
  0xa4   : > { %1563 = vmatprep.mubr.bf16.mxu0 %v3324_v15  ;;  %v3878_v27 = vld [vmem:[#allocation5 + $0xc4] ss:$8 sps:$4 sm:$0xff]   ;;  %v3880_v28 = vld [vmem:[#allocation5 + $0xc0] ss:$8 sps:$4 sm:$0xff]   ;;  %v3881_v29 = vld [vmem:[#allocation5 + $0xd4] ss:$8 sps:$4 sm:$0xff]  }
  0xa5   : > { %1536 = vmatpush1.bf16.msra.mxu0 %v3850_v5  ;;  %v3883_v30 = vld [vmem:[#allocation5 + $0xd0] ss:$8 sps:$4 sm:$0xff]   ;;  %v3884_v31 = vld [vmem:[#allocation5 + $0xe4] ss:$8 sps:$4 sm:$0xff]   ;;  %v3886_v32 = vld [vmem:[#allocation5 + $0xe0] ss:$8 sps:$4 sm:$0xff]  }
  0xa6   : > { %1537 = vmatprep.subr.bf16.mxu0 %v3851_v6  ;;  %v3887_v33 = vld [vmem:[#allocation5 + $0xf4] ss:$8 sps:$4 sm:$0xff]   ;;  %v3889_v34 = vld [vmem:[#allocation5 + $0xf0] ss:$8 sps:$4 sm:$0xff]   ;;  %v3892_v35 = vld [vmem:[#allocation5 + $0x104] ss:$8 sps:$4 sm:$0xff]  }
  0xa7   : > { %v368_v36 = vld [vmem:[%s4675_s21 + $0x40] sm:$0xff]  ;;  %v3895_v41 = vld [vmem:[#allocation5 + $0x114] ss:$8 sps:$4 sm:$0xff]   ;;  %v3893_v42 = vld [vmem:[#allocation5 + $0x110] ss:$8 sps:$4 sm:$0xff]   ;;  %s3620_s18 = sshll.u32 %s4469_s28, 12 }
  0xa8   : > { %v372_v37 = vld [vmem:[%s4675_s21 + $0x60] sm:$0xff]  ;;  %v3901_v49 = vld [vmem:[#allocation5 + $0x134] ss:$8 sps:$4 sm:$0xff]   ;;  %v3899_v50 = vld [vmem:[#allocation5 + $0x130] ss:$8 sps:$4 sm:$0xff]   ;;  %s3194_s10 = sshll.u32 %s5027_s14, 4  ;;  %s5148_s17 = scalar_lea.hbm %s5205_s7, %s3620_s18  ;;  %s5150_s10 = int_to_ptr.vmem [resolvable:$true] %s3194_s10 }
  0xa9   : > { %1538 = vmatpush1.bf16.msra.mxu0 %v3853_v7  ;;  %v3890_v39 = vld [vmem:[#allocation5 + $0x100] ss:$8 sps:$4 sm:$0xff]   ;;  %v3332_v40 = vcombine.high %v368_v36, %v372_v37  ;;  %v3898_v43 = vld [vmem:[#allocation5 + $0x124] ss:$8 sps:$4 sm:$0xff]   ;;  %v3331_v46 = vcombine.low %v368_v36, %v372_v37  ;;  %v3907_v57 = vld [vmem:[#allocation5 + $0x154] ss:$8 sps:$4 sm:$0xff]  }
  0xaa   : > { %1539 = vmatprep.subr.bf16.mxu0 %v3854_v8  ;;  %v376_v44 = vld [vmem:[%s4675_s21 + $0x80] sm:$0xff]  ;;  %v3905_v58 = vld [vmem:[#allocation5 + $0x150] ss:$8 sps:$4 sm:$0xff]   ;;  %v3913_v1 = vld [vmem:[#allocation5 + $0x174] ss:$8 sps:$4 sm:$0xff]   ;;  %s3180_s28 = scalar_lea.sflag [#allocation4], %s4671_s23 }
  0xab   : > { %v380_v45 = vld [vmem:[%s4675_s21 + $0xa0] sm:$0xff]  ;;  %v3911_v2 = vld [vmem:[#allocation5 + $0x170] ss:$8 sps:$4 sm:$0xff]   ;;  %v369_v36 = vld [vmem:[%s4675_s21 + $0x48] sm:$0xff]  ;;  %s4320_s13 = scalar_lea.vmem %s5150_s10, 4096  ;;  %s4405_s15 = smov [#allocation11]  }
  0xac   : > { %v3896_v47 = vld [vmem:[#allocation5 + $0x120] ss:$8 sps:$4 sm:$0xff]   ;;  %v3340_v48 = vcombine.high %v376_v44, %v380_v45  ;;  %v3904_v51 = vld [vmem:[#allocation5 + $0x144] ss:$8 sps:$4 sm:$0xff]   ;;  %v3339_v54 = vcombine.low %v376_v44, %v380_v45  ;;  %p4321_p3 = scmp.ne.s32.totalorder %s5150_s10, %s4320_s13 }
  0xad   : > { %1540 = vmatpush1.bf16.msra.mxu0 %v3856_v9  ;;  %v384_v52 = vld [vmem:[%s4675_s21 + $0xc0] sm:$0xff]  ;;  %v3919_v9 = vld [vmem:[#allocation5 + $0x194] ss:$8 sps:$4 sm:$0xff]   ;;  %v373_v37 = vld [vmem:[%s4675_s21 + $0x68] sm:$0xff] }
  0xae   : > { %1541 = vmatprep.subr.bf16.mxu0 %v3857_v10  ;;  %v388_v53 = vld [vmem:[%s4675_s21 + $0xe0] sm:$0xff]  ;;  %v3917_v10 = vld [vmem:[#allocation5 + $0x190] ss:$8 sps:$4 sm:$0xff]   ;;  %v377_v44 = vld [vmem:[%s4675_s21 + $0x88] sm:$0xff]  ;;  %p4322_p5 = pnand %p4321_p3, %p4619_p10 }
  0xaf   : > { %v3902_v55 = vld [vmem:[#allocation5 + $0x140] ss:$8 sps:$4 sm:$0xff]   ;;  %v3348_v56 = vcombine.high %v384_v52, %v388_v53  ;;  %v3910_v59 = vld [vmem:[#allocation5 + $0x164] ss:$8 sps:$4 sm:$0xff]   ;;  %v3347_v62 = vcombine.low %v384_v52, %v388_v53 }
  0xb0   : > { %v392_v60 = vld [vmem:[%s4675_s21 + $0x100] sm:$0xff]  ;;  %v381_v45 = vld [vmem:[%s4675_s21 + $0xa8] sm:$0xff]  ;;  %p4323_p7 = pneg %p4322_p5 }
  0xb1   : > { %1542 = vmatpush1.bf16.msra.mxu0 %v3859_v11  ;;  %v396_v61 = vld [vmem:[%s4675_s21 + $0x120] sm:$0xff]  ;;  %v385_v52 = vld [vmem:[%s4675_s21 + $0xc8] sm:$0xff] }
  0xb2   : > { %1543 = vmatprep.subr.bf16.mxu0 %v3860_v12  ;;  %v3908_v63 = vld [vmem:[#allocation5 + $0x160] ss:$8 sps:$4 sm:$0xff]   ;;  %v3356_v0 = vcombine.high %v392_v60, %v396_v61  ;;  %v3916_v3 = vld [vmem:[#allocation5 + $0x184] ss:$8 sps:$4 sm:$0xff]   ;;  %v3355_v6 = vcombine.low %v392_v60, %v396_v61 }
  0xb3   : > { %v400_v4 = vld [vmem:[%s4675_s21 + $0x140] sm:$0xff]  ;;  %v389_v53 = vld [vmem:[%s4675_s21 + $0xe8] sm:$0xff] }
  0xb4   : > { %v404_v5 = vld [vmem:[%s4675_s21 + $0x160] sm:$0xff]  ;;  %v393_v60 = vld [vmem:[%s4675_s21 + $0x108] sm:$0xff] }
  0xb5   : > { %1544 = vmatpush1.bf16.msra.mxu0 %v3862_v16  ;;  %v3914_v7 = vld [vmem:[#allocation5 + $0x180] ss:$8 sps:$4 sm:$0xff]   ;;  %v3364_v8 = vcombine.high %v400_v4, %v404_v5  ;;  %v3922_v11 = vld [vmem:[#allocation5 + $0x1a4] ss:$8 sps:$4 sm:$0xff]   ;;  %v3363_v14 = vcombine.low %v400_v4, %v404_v5 }
  0xb6   : > { %1545 = vmatprep.subr.bf16.mxu0 %v3863_v17  ;;  %v408_v12 = vld [vmem:[%s4675_s21 + $0x180] sm:$0xff]  ;;  %v3925_v17 = vld [vmem:[#allocation5 + $0x1b4] ss:$8 sps:$4 sm:$0xff]   ;;  %v397_v61 = vld [vmem:[%s4675_s21 + $0x128] sm:$0xff] }
  0xb7   : > { %v412_v13 = vld [vmem:[%s4675_s21 + $0x1a0] sm:$0xff]  ;;  %v401_v4 = vld [vmem:[%s4675_s21 + $0x148] sm:$0xff] }
  0xb8   : > { %v3920_v15 = vld [vmem:[#allocation5 + $0x1a0] ss:$8 sps:$4 sm:$0xff]   ;;  %v3372_v16 = vcombine.high %v408_v12, %v412_v13 }
  0xb9   : > { %1546 = vmatpush1.bf16.msra.mxu0 %v3865_v18  ;;  %v3923_v18 = vld [vmem:[#allocation5 + $0x1b0] ss:$8 sps:$4 sm:$0xff]   ;;  %v405_v5 = vld [vmem:[%s4675_s21 + $0x168] sm:$0xff] }
  0xba   : > { %1547 = vmatprep.subr.bf16.mxu0 %v3866_v19  ;;  %v3928_v19 = vld [vmem:[#allocation5 + $0x1c4] ss:$8 sps:$4 sm:$0xff]  }
  0xbd   : > { %1548 = vmatpush1.bf16.msra.mxu0 %v3868_v20  ;;  %v416_v20 = vld [vmem:[%s4675_s21 + $0x1c0] sm:$0xff] }
  0xbe   : > { %1549 = vmatprep.subr.bf16.mxu0 %v3869_v21  ;;  %v420_v21 = vld [vmem:[%s4675_s21 + $0x1e0] sm:$0xff] }
  0xc1   : > { %1550 = vmatpush1.bf16.msra.mxu0 %v3871_v22  ;;  %v3371_v22 = vcombine.low %v408_v12, %v412_v13  ;;  %v409_v12 = vld [vmem:[%s4675_s21 + $0x188] sm:$0xff] }
  0xc2   : > { %1551 = vmatprep.subr.bf16.mxu0 %v3872_v23  ;;  %v3926_v23 = vld [vmem:[#allocation5 + $0x1c0] ss:$8 sps:$4 sm:$0xff]  }
  0xc3   : > { %v413_v13 = vld [vmem:[%s4675_s21 + $0x1a8] sm:$0xff] }
  0xc5   : > { %1552 = vmatpush1.bf16.msra.mxu0 %v3874_v24  ;;  %v3380_v24 = vcombine.high %v416_v20, %v420_v21 }
  0xc6   : > { %1553 = vmatprep.subr.bf16.mxu0 %v3875_v25  ;;  %v3931_v25 = vld [vmem:[#allocation5 + $0x1d4] ss:$8 sps:$4 sm:$0xff]  }
  0xc9   : > { %1554 = vmatpush1.bf16.msra.mxu0 %v3877_v26  ;;  %v3929_v26 = vld [vmem:[#allocation5 + $0x1d0] ss:$8 sps:$4 sm:$0xff]  }
  0xca   : > { %1555 = vmatprep.subr.bf16.mxu0 %v3878_v27  ;;  %v3934_v27 = vld [vmem:[#allocation5 + $0x1e4] ss:$8 sps:$4 sm:$0xff]  }
  0xcd   : > { %1556 = vmatpush1.bf16.msra.mxu0 %v3880_v28  ;;  %v361_v28 = vld [vmem:[%s4675_s21 + $0x8] sm:$0xff] }
  0xce   : > { %1557 = vmatprep.subr.bf16.mxu0 %v3881_v29  ;;  %v365_v29 = vld [vmem:[%s4675_s21 + $0x28] sm:$0xff] }
  0xd1   : > { %1558 = vmatpush1.bf16.msra.mxu0 %v3883_v30  ;;  %v3379_v30 = vcombine.low %v416_v20, %v420_v21  ;;  %v417_v20 = vld [vmem:[%s4675_s21 + $0x1c8] sm:$0xff] }
  0xd2   : > { %1559 = vmatprep.subr.bf16.mxu0 %v3884_v31  ;;  %v3932_v31 = vld [vmem:[#allocation5 + $0x1e0] ss:$8 sps:$4 sm:$0xff]  }
  0xd3   : > { %v421_v21 = vld [vmem:[%s4675_s21 + $0x1e8] sm:$0xff] }
  0xd5   : > { %1560 = vmatpush1.bf16.msra.mxu0 %v3886_v32  ;;  %v3326_v32 = vcombine.high %v361_v28, %v365_v29 }
  0xd6   : > { %1561 = vmatprep.subr.bf16.mxu0 %v3887_v33  ;;  %v3937_v33 = vld [vmem:[#allocation5 + $0x1f4] ss:$8 sps:$4 sm:$0xff]  }
  0xd9   : > { %1562 = vmatpush1.bf16.msra.mxu0 %v3889_v34  ;;  %v3935_v34 = vld [vmem:[#allocation5 + $0x1f0] ss:$8 sps:$4 sm:$0xff]  }
  0xda   : > { %1644 = vmatprep.subr.bf16.mxu0 %v3892_v35  ;;  %v3940_v35 = vld [vmem:[#allocation5 + $0x204] ss:$8 sps:$4 sm:$0xff]  }
  0xdc   : > { %1564 = vmatmul.mubr.bf16.vlgmr.msra.gmra.mrb[0].mxu0 %v3323_v38  ;;  %v3325_v38 = vcombine.low %v361_v28, %v365_v29  ;;  %v362_v28 = vld [vmem:[%s4675_s21 + $0x10] sm:$0xff] }
  0xdd   : > { %1645 = vmatpush1.bf16.msra.mxu0 %v3890_v39  ;;  %1573 = vmatprep.mubr.bf16.mxu0 %v3332_v40  ;;  %v3938_v39 = vld [vmem:[#allocation5 + $0x200] ss:$8 sps:$4 sm:$0xff]   ;;  %v3943_v40 = vld [vmem:[#allocation5 + $0x214] ss:$8 sps:$4 sm:$0xff]  }
  0xde   : > { %1646 = vmatprep.subr.bf16.mxu0 %v3895_v41  ;;  %v3334_v41 = vcombine.high %v369_v36, %v373_v37  ;;  %v366_v29 = vld [vmem:[%s4675_s21 + $0x30] sm:$0xff] }
  0xe1   : > { %1647 = vmatpush1.bf16.msra.mxu0 %v3893_v42  ;;  %v3941_v42 = vld [vmem:[#allocation5 + $0x210] ss:$8 sps:$4 sm:$0xff]  }
  0xe2   : > { %1648 = vmatprep.subr.bf16.mxu0 %v3898_v43  ;;  %v3946_v43 = vld [vmem:[#allocation5 + $0x224] ss:$8 sps:$4 sm:$0xff]  }
  0xe4   : > { %1574 = vmatmul.mubr.bf16.gmra.mrb[4].mxu0 %v3331_v46  ;;  %v3333_v46 = vcombine.low %v369_v36, %v373_v37  ;;  %v4037_v36 = vld [vmem:[#allocation7 + $0x14] ss:$8 sps:$4 sm:$0xff]   ;;  %v3983_v37 = vld [vmem:[#allocation5 + $0x2f0] ss:$8 sps:$4 sm:$0xff]  }
  0xe5   : > { %1649 = vmatpush1.bf16.msra.mxu0 %v3896_v47  ;;  %1583 = vmatprep.mubr.bf16.mxu0 %v3340_v48  ;;  %v3944_v47 = vld [vmem:[#allocation5 + $0x220] ss:$8 sps:$4 sm:$0xff]   ;;  %v3342_v48 = vcombine.high %v377_v44, %v381_v45 }
  0xe6   : > { %1650 = vmatprep.subr.bf16.mxu0 %v3901_v49  ;;  %v3949_v49 = vld [vmem:[#allocation5 + $0x234] ss:$8 sps:$4 sm:$0xff]  }
  0xe9   : > { %1651 = vmatpush1.bf16.msra.mxu0 %v3899_v50  ;;  %v3947_v50 = vld [vmem:[#allocation5 + $0x230] ss:$8 sps:$4 sm:$0xff]  }
  0xea   : > { %1652 = vmatprep.subr.bf16.mxu0 %v3904_v51  ;;  %v3952_v51 = vld [vmem:[#allocation5 + $0x244] ss:$8 sps:$4 sm:$0xff]  }
  0xec   : > { %1584 = vmatmul.mubr.bf16.gmra.mrb[8].mxu0 %v3339_v54  ;;  %v3341_v54 = vcombine.low %v377_v44, %v381_v45  ;;  %v3986_v44 = vld [vmem:[#allocation5 + $0x300] ss:$8 sps:$4 sm:$0xff]  }
  0xed   : > { %1653 = vmatpush1.bf16.msra.mxu0 %v3902_v55  ;;  %1593 = vmatprep.mubr.bf16.mxu0 %v3348_v56  ;;  %v3950_v55 = vld [vmem:[#allocation5 + $0x240] ss:$8 sps:$4 sm:$0xff]   ;;  %v3350_v56 = vcombine.high %v385_v52, %v389_v53 }
  0xee   : > { %1654 = vmatprep.subr.bf16.mxu0 %v3907_v57  ;;  %v3955_v57 = vld [vmem:[#allocation5 + $0x254] ss:$8 sps:$4 sm:$0xff]  }
  0xf1   : > { %1655 = vmatpush1.bf16.msra.mxu0 %v3905_v58  ;;  %v3953_v58 = vld [vmem:[#allocation5 + $0x250] ss:$8 sps:$4 sm:$0xff]  }
  0xf2   : > { %1656 = vmatprep.subr.bf16.mxu0 %v3910_v59  ;;  %v3958_v59 = vld [vmem:[#allocation5 + $0x264] ss:$8 sps:$4 sm:$0xff]  }
  0xf4   : > { %1594 = vmatmul.mubr.bf16.gmra.mrb[12].mxu0 %v3347_v62  ;;  %v3349_v62 = vcombine.low %v385_v52, %v389_v53  ;;  %v382_v52 = vld [vmem:[%s4675_s21 + $0xb0] sm:$0xff] }
  0xf5   : > { %1657 = vmatpush1.bf16.msra.mxu0 %v3908_v63  ;;  %1603 = vmatprep.mubr.bf16.mxu0 %v3356_v0  ;;  %v3956_v63 = vld [vmem:[#allocation5 + $0x260] ss:$8 sps:$4 sm:$0xff]   ;;  %v3358_v0 = vcombine.high %v393_v60, %v397_v61  ;;  %v4045_v53 = vld [vmem:[#allocation7 + $0x30] ss:$8 sps:$4 sm:$0xff]  }
  0xf6   : > { %1658 = vmatprep.subr.bf16.mxu0 %v3913_v1  ;;  %v3961_v1 = vld [vmem:[#allocation5 + $0x274] ss:$8 sps:$4 sm:$0xff]  }
  0xf9   : > { %1659 = vmatpush1.bf16.msra.mxu0 %v3911_v2  ;;  %v3959_v2 = vld [vmem:[#allocation5 + $0x270] ss:$8 sps:$4 sm:$0xff]  }
  0xfa   : > { %1660 = vmatprep.subr.bf16.mxu0 %v3916_v3  ;;  %v3964_v3 = vld [vmem:[#allocation5 + $0x284] ss:$8 sps:$4 sm:$0xff]  }
  0xfc   : > { %1604 = vmatmul.mubr.bf16.gmra.mrb[16].mxu0 %v3355_v6  ;;  %v3357_v6 = vcombine.low %v393_v60, %v397_v61  ;;  %v4049_v60 = vld [vmem:[#allocation7 + $0x54] ss:$8 sps:$4 sm:$0xff]   ;;  %v3995_v61 = vld [vmem:[#allocation5 + $0x330] ss:$8 sps:$4 sm:$0xff]  }
  0xfd   : > { %1661 = vmatpush1.bf16.msra.mxu0 %v3914_v7  ;;  %1613 = vmatprep.mubr.bf16.mxu0 %v3364_v8  ;;  %v3962_v7 = vld [vmem:[#allocation5 + $0x280] ss:$8 sps:$4 sm:$0xff]   ;;  %v3366_v8 = vcombine.high %v401_v4, %v405_v5 }
  0xfe   : > { %1662 = vmatprep.subr.bf16.mxu0 %v3919_v9  ;;  %v3967_v9 = vld [vmem:[#allocation5 + $0x294] ss:$8 sps:$4 sm:$0xff]  }
 0x101   : > { %1663 = vmatpush1.bf16.msra.mxu0 %v3917_v10  ;;  %v3965_v10 = vld [vmem:[#allocation5 + $0x290] ss:$8 sps:$4 sm:$0xff]  }
 0x102   : > { %1664 = vmatprep.subr.bf16.mxu0 %v3922_v11  ;;  %v3970_v11 = vld [vmem:[#allocation5 + $0x2a4] ss:$8 sps:$4 sm:$0xff]  }
 0x104   : > { %1614 = vmatmul.mubr.bf16.gmra.mrb[20].mxu0 %v3363_v14  ;;  %v3365_v14 = vcombine.low %v401_v4, %v405_v5  ;;  %v3998_v4 = vld [vmem:[#allocation5 + $0x340] ss:$8 sps:$4 sm:$0xff]  }
 0x105   : > { %1665 = vmatpush1.bf16.msra.mxu0 %v3920_v15  ;;  %1623 = vmatprep.mubr.bf16.mxu0 %v3372_v16  ;;  %v3968_v15 = vld [vmem:[#allocation5 + $0x2a0] ss:$8 sps:$4 sm:$0xff]   ;;  %v3374_v16 = vcombine.high %v409_v12, %v413_v13 }
 0x106   : > { %1666 = vmatprep.subr.bf16.mxu0 %v3925_v17  ;;  %v3973_v17 = vld [vmem:[#allocation5 + $0x2b4] ss:$8 sps:$4 sm:$0xff]  }
 0x109   : > { %1667 = vmatpush1.bf16.msra.mxu0 %v3923_v18  ;;  %v3971_v18 = vld [vmem:[#allocation5 + $0x2b0] ss:$8 sps:$4 sm:$0xff]  }
 0x10a   : > { %1668 = vmatprep.subr.bf16.mxu0 %v3928_v19  ;;  %v3976_v19 = vld [vmem:[#allocation5 + $0x2c4] ss:$8 sps:$4 sm:$0xff]  }
 0x10c   : > { %1624 = vmatmul.mubr.bf16.gmra.mrb[24].mxu0 %v3371_v22  ;;  %v3373_v22 = vcombine.low %v409_v12, %v413_v13  ;;  %v398_v12 = vld [vmem:[%s4675_s21 + $0x130] sm:$0xff] }
 0x10d   : > { %1669 = vmatpush1.bf16.msra.mxu0 %v3926_v23  ;;  %1633 = vmatprep.mubr.bf16.mxu0 %v3380_v24  ;;  %v3974_v23 = vld [vmem:[#allocation5 + $0x2c0] ss:$8 sps:$4 sm:$0xff]   ;;  %v3382_v24 = vcombine.high %v417_v20, %v421_v21  ;;  %v4057_v13 = vld [vmem:[#allocation7 + $0x70] ss:$8 sps:$4 sm:$0xff]  }
 0x10e   : > { %1670 = vmatprep.subr.bf16.mxu0 %v3931_v25  ;;  %v3979_v25 = vld [vmem:[#allocation5 + $0x2d4] ss:$8 sps:$4 sm:$0xff]  }
 0x111   : > { %1671 = vmatpush1.bf16.msra.mxu0 %v3929_v26  ;;  %v3977_v26 = vld [vmem:[#allocation5 + $0x2d0] ss:$8 sps:$4 sm:$0xff]  }
 0x112   : > { %1672 = vmatprep.subr.bf16.mxu0 %v3934_v27  ;;  %v3982_v27 = vld [vmem:[#allocation5 + $0x2e4] ss:$8 sps:$4 sm:$0xff]  }
 0x114   : > { %1634 = vmatmul.mubr.bf16.gmra.mrb[28].mxu0 %v3379_v30  ;;  %v3381_v30 = vcombine.low %v417_v20, %v421_v21  ;;  %v4061_v20 = vld [vmem:[#allocation7 + $0x94] ss:$8 sps:$4 sm:$0xff]   ;;  %v4007_v21 = vld [vmem:[#allocation5 + $0x370] ss:$8 sps:$4 sm:$0xff]  }
 0x115   : > { %1673 = vmatpush1.bf16.msra.mxu0 %v3932_v31  ;;  %1676 = vmatprep.mubr.bf16.mxu0 %v3326_v32  ;;  %v3980_v31 = vld [vmem:[#allocation5 + $0x2e0] ss:$8 sps:$4 sm:$0xff]   ;;  %v3328_v32 = vcombine.high %v362_v28, %v366_v29 }
 0x116   : > { %1674 = vmatprep.subr.bf16.mxu0 %v3937_v33  ;;  %v3985_v33 = vld [vmem:[#allocation5 + $0x2f4] ss:$8 sps:$4 sm:$0xff]  }
 0x119   : > { %1675 = vmatpush1.bf16.msra.mxu0 %v3935_v34  ;;  %v4034_v34 = vld [vmem:[#allocation7 + $0x4] ss:$8 sps:$4 sm:$0xff]  }
 0x11a   : > { %1757 = vmatprep.subr.bf16.mxu0 %v3940_v35  ;;  %v4036_v35 = vld [vmem:[#allocation7] ss:$8 sps:$4 sm:$0xff]   ;;  %2210 = vmatprep.subr.bf16.mxu1 %v4034_v34  ;;  %v4018_v34 = vld [vmem:[#allocation5 + $0x3a4] ss:$8 sps:$4 sm:$0xff]  }
 0x11b   : > { %2211 = vmatpush1.bf16.msra.mxu1 %v4036_v35  ;;  %v410_v35 = vld [vmem:[%s4675_s21 + $0x190] sm:$0xff] }
 0x11c   : > { %1677 = vmatmul.mubr.bf16.vlgmr.msra.gmra.mrb[0].mxu0 %v3325_v38  ;;  %v3988_v38 = vld [vmem:[#allocation5 + $0x304] ss:$8 sps:$4 sm:$0xff]   ;;  %2212 = vmatprep.subr.bf16.mxu1 %v4037_v36  ;;  %v414_v36 = vld [vmem:[%s4675_s21 + $0x1b0] sm:$0xff] }
 0x11d   : > { %1758 = vmatpush1.bf16.msra.mxu0 %v3938_v39  ;;  %1686 = vmatprep.mubr.bf16.mxu0 %v3334_v41  ;;  %v370_v39 = vld [vmem:[%s4675_s21 + $0x50] sm:$0xff] }
 0x11e   : > { %1759 = vmatprep.subr.bf16.mxu0 %v3943_v40  ;;  %v374_v40 = vld [vmem:[%s4675_s21 + $0x70] sm:$0xff] }
 0x11f   : > { %v4039_v41 = vld [vmem:[#allocation7 + $0x10] ss:$8 sps:$4 sm:$0xff]   ;;  %v3336_v45 = vcombine.high %v370_v39, %v374_v40 }
 0x120   : > { %2213 = vmatpush1.bf16.msra.mxu1 %v4039_v41  ;;  %v3376_v41 = vcombine.high %v410_v35, %v414_v36 }
 0x121   : > { %1760 = vmatpush1.bf16.msra.mxu0 %v3941_v42  ;;  %v3327_v42 = vcombine.low %v362_v28, %v366_v29  ;;  %v4010_v28 = vld [vmem:[#allocation5 + $0x380] ss:$8 sps:$4 sm:$0xff]  }
 0x122   : > { %1761 = vmatprep.subr.bf16.mxu0 %v3946_v43  ;;  %v4040_v43 = vld [vmem:[#allocation7 + $0x24] ss:$8 sps:$4 sm:$0xff]  }
 0x123   : > { %2214 = vmatprep.subr.bf16.mxu1 %v4040_v43  ;;  %v4072_v43 = vld [vmem:[#allocation7 + $0xc0] ss:$8 sps:$4 sm:$0xff]  }
 0x124   : > { %1687 = vmatmul.mubr.bf16.gmra.mrb[4].mxu0 %v3333_v46  ;;  %v3991_v46 = vld [vmem:[#allocation5 + $0x314] ss:$8 sps:$4 sm:$0xff]  }
 0x125   : > { %1762 = vmatpush1.bf16.msra.mxu0 %v3944_v47  ;;  %1696 = vmatprep.mubr.bf16.mxu0 %v3342_v48  ;;  %v4042_v47 = vld [vmem:[#allocation7 + $0x20] ss:$8 sps:$4 sm:$0xff]   ;;  %v4043_v48 = vld [vmem:[#allocation7 + $0x34] ss:$8 sps:$4 sm:$0xff]  }
 0x126   : > { %1763 = vmatprep.subr.bf16.mxu0 %v3949_v49  ;;  %v3989_v49 = vld [vmem:[#allocation5 + $0x310] ss:$8 sps:$4 sm:$0xff]   ;;  %2215 = vmatpush1.bf16.msra.mxu1 %v4042_v47 }
 0x127   : > { %2216 = vmatprep.subr.bf16.mxu1 %v4043_v48  ;;  %v418_v47 = vld [vmem:[%s4675_s21 + $0x1d0] sm:$0xff] }
 0x128   : > { %v422_v48 = vld [vmem:[%s4675_s21 + $0x1f0] sm:$0xff] }
 0x129   : > { %1764 = vmatpush1.bf16.msra.mxu0 %v3947_v50  ;;  %v3994_v50 = vld [vmem:[#allocation5 + $0x324] ss:$8 sps:$4 sm:$0xff]  }
 0x12a   : > { %1765 = vmatprep.subr.bf16.mxu0 %v3952_v51  ;;  %v378_v51 = vld [vmem:[%s4675_s21 + $0x90] sm:$0xff]  ;;  %2217 = vmatpush1.bf16.msra.mxu1 %v4045_v53 }
 0x12b   : > { %v4027_v53 = vld [vmem:[#allocation5 + $0x3d4] ss:$8 sps:$4 sm:$0xff]  }
 0x12c   : > { %1697 = vmatmul.mubr.bf16.gmra.mrb[8].mxu0 %v3341_v54  ;;  %v3335_v54 = vcombine.low %v370_v39, %v374_v40  ;;  %v4070_v39 = vld [vmem:[#allocation7 + $0xc4] ss:$8 sps:$4 sm:$0xff]   ;;  %v4016_v40 = vld [vmem:[#allocation5 + $0x3a0] ss:$8 sps:$4 sm:$0xff]  }
 0x12d   : > { %1766 = vmatpush1.bf16.msra.mxu0 %v3950_v55  ;;  %1706 = vmatprep.mubr.bf16.mxu0 %v3350_v56  ;;  %v4046_v55 = vld [vmem:[#allocation7 + $0x44] ss:$8 sps:$4 sm:$0xff]   ;;  %v3992_v56 = vld [vmem:[#allocation5 + $0x320] ss:$8 sps:$4 sm:$0xff]  }
 0x12e   : > { %1767 = vmatprep.subr.bf16.mxu0 %v3955_v57  ;;  %v3344_v57 = vcombine.high %v378_v51, %v382_v52  ;;  %2218 = vmatprep.subr.bf16.mxu1 %v4046_v55  ;;  %v4030_v55 = vld [vmem:[#allocation5 + $0x3e4] ss:$8 sps:$4 sm:$0xff]  }
 0x131   : > { %1768 = vmatpush1.bf16.msra.mxu0 %v3953_v58  ;;  %v3997_v58 = vld [vmem:[#allocation5 + $0x334] ss:$8 sps:$4 sm:$0xff]  }
 0x132   : > { %1769 = vmatprep.subr.bf16.mxu0 %v3958_v59  ;;  %v4048_v59 = vld [vmem:[#allocation7 + $0x40] ss:$8 sps:$4 sm:$0xff]  }
 0x133   : > { %2219 = vmatpush1.bf16.msra.mxu1 %v4048_v59  ;;  %v4028_v59 = vld [vmem:[#allocation5 + $0x3e0] ss:$8 sps:$4 sm:$0xff]  }
 0x134   : > { %1707 = vmatmul.mubr.bf16.gmra.mrb[12].mxu0 %v3349_v62  ;;  %v4000_v62 = vld [vmem:[#allocation5 + $0x344] ss:$8 sps:$4 sm:$0xff]   ;;  %2220 = vmatprep.subr.bf16.mxu1 %v4049_v60 }
 0x135   : > { %1770 = vmatpush1.bf16.msra.mxu0 %v3956_v63  ;;  %1716 = vmatprep.mubr.bf16.mxu0 %v3358_v0  ;;  %v386_v63 = vld [vmem:[%s4675_s21 + $0xd0] sm:$0xff] }
 0x136   : > { %1771 = vmatprep.subr.bf16.mxu0 %v3961_v1  ;;  %v390_v0 = vld [vmem:[%s4675_s21 + $0xf0] sm:$0xff] }
 0x137   : > { %v4051_v1 = vld [vmem:[#allocation7 + $0x50] ss:$8 sps:$4 sm:$0xff]   ;;  %v3352_v5 = vcombine.high %v386_v63, %v390_v0 }
 0x138   : > { %2221 = vmatpush1.bf16.msra.mxu1 %v4051_v1 }
 0x139   : > { %1772 = vmatpush1.bf16.msra.mxu0 %v3959_v2  ;;  %v3343_v2 = vcombine.low %v378_v51, %v382_v52  ;;  %v4022_v51 = vld [vmem:[#allocation5 + $0x3c0] ss:$8 sps:$4 sm:$0xff]   ;;  %v3384_v52 = vcombine.high %v418_v47, %v422_v48 }
 0x13a   : > { %1773 = vmatprep.subr.bf16.mxu0 %v3964_v3  ;;  %v4052_v3 = vld [vmem:[#allocation7 + $0x64] ss:$8 sps:$4 sm:$0xff]  }
 0x13b   : > { %2222 = vmatprep.subr.bf16.mxu1 %v4052_v3  ;;  %v379_v3 = vld [vmem:[%s4675_s21 + $0x98] sm:$0xff] }
 0x13c   : > { %1717 = vmatmul.mubr.bf16.gmra.mrb[16].mxu0 %v3357_v6  ;;  %v4003_v6 = vld [vmem:[#allocation5 + $0x354] ss:$8 sps:$4 sm:$0xff]  }
 0x13d   : > { %1774 = vmatpush1.bf16.msra.mxu0 %v3962_v7  ;;  %1726 = vmatprep.mubr.bf16.mxu0 %v3366_v8  ;;  %v4054_v7 = vld [vmem:[#allocation7 + $0x60] ss:$8 sps:$4 sm:$0xff]   ;;  %v4055_v8 = vld [vmem:[#allocation7 + $0x74] ss:$8 sps:$4 sm:$0xff]  }
 0x13e   : > { %1775 = vmatprep.subr.bf16.mxu0 %v3967_v9  ;;  %v4001_v9 = vld [vmem:[#allocation5 + $0x350] ss:$8 sps:$4 sm:$0xff]   ;;  %2223 = vmatpush1.bf16.msra.mxu1 %v4054_v7 }
 0x13f   : > { %2224 = vmatprep.subr.bf16.mxu1 %v4055_v8  ;;  %v387_v7 = vld [vmem:[%s4675_s21 + $0xd8] sm:$0xff] }
 0x140   : > { %v391_v8 = vld [vmem:[%s4675_s21 + $0xf8] sm:$0xff] }
 0x141   : > { %1776 = vmatpush1.bf16.msra.mxu0 %v3965_v10  ;;  %v4006_v10 = vld [vmem:[#allocation5 + $0x364] ss:$8 sps:$4 sm:$0xff]  }
 0x142   : > { %1777 = vmatprep.subr.bf16.mxu0 %v3970_v11  ;;  %v394_v11 = vld [vmem:[%s4675_s21 + $0x110] sm:$0xff]  ;;  %2225 = vmatpush1.bf16.msra.mxu1 %v4057_v13  ;;  %v3353_v13 = vcombine.low %v387_v7, %v391_v8 }
 0x144   : > { %1727 = vmatmul.mubr.bf16.gmra.mrb[20].mxu0 %v3365_v14  ;;  %v3351_v14 = vcombine.low %v386_v63, %v390_v0  ;;  %v371_v63 = vld [vmem:[%s4675_s21 + $0x58] sm:$0xff] }
 0x145   : > { %1778 = vmatpush1.bf16.msra.mxu0 %v3968_v15  ;;  %1736 = vmatprep.mubr.bf16.mxu0 %v3374_v16  ;;  %v4058_v15 = vld [vmem:[#allocation7 + $0x84] ss:$8 sps:$4 sm:$0xff]   ;;  %v4004_v16 = vld [vmem:[#allocation5 + $0x360] ss:$8 sps:$4 sm:$0xff]   ;;  %v375_v0 = vld [vmem:[%s4675_s21 + $0x78] sm:$0xff] }
 0x146   : > { %1779 = vmatprep.subr.bf16.mxu0 %v3973_v17  ;;  %v3360_v17 = vcombine.high %v394_v11, %v398_v12  ;;  %2226 = vmatprep.subr.bf16.mxu1 %v4058_v15  ;;  %v403_v15 = vld [vmem:[%s4675_s21 + $0x158] sm:$0xff] }
 0x149   : > { %1780 = vmatpush1.bf16.msra.mxu0 %v3971_v18  ;;  %v4009_v18 = vld [vmem:[#allocation5 + $0x374] ss:$8 sps:$4 sm:$0xff]  }
 0x14a   : > { %1781 = vmatprep.subr.bf16.mxu0 %v3976_v19  ;;  %v4060_v19 = vld [vmem:[#allocation7 + $0x80] ss:$8 sps:$4 sm:$0xff]  }
 0x14b   : > { %2227 = vmatpush1.bf16.msra.mxu1 %v4060_v19  ;;  %v411_v19 = vld [vmem:[%s4675_s21 + $0x198] sm:$0xff] }
 0x14c   : > { %1737 = vmatmul.mubr.bf16.gmra.mrb[24].mxu0 %v3373_v22  ;;  %v4012_v22 = vld [vmem:[#allocation5 + $0x384] ss:$8 sps:$4 sm:$0xff]   ;;  %2228 = vmatprep.subr.bf16.mxu1 %v4061_v20  ;;  %v415_v20 = vld [vmem:[%s4675_s21 + $0x1b8] sm:$0xff] }
 0x14d   : > { %1782 = vmatpush1.bf16.msra.mxu0 %v3974_v23  ;;  %1746 = vmatprep.mubr.bf16.mxu0 %v3382_v24  ;;  %v402_v23 = vld [vmem:[%s4675_s21 + $0x150] sm:$0xff] }
 0x14e   : > { %1783 = vmatprep.subr.bf16.mxu0 %v3979_v25  ;;  %v406_v24 = vld [vmem:[%s4675_s21 + $0x170] sm:$0xff] }
 0x14f   : > { %v4063_v25 = vld [vmem:[#allocation7 + $0x90] ss:$8 sps:$4 sm:$0xff]   ;;  %v3368_v29 = vcombine.high %v402_v23, %v406_v24 }
 0x150   : > { %2229 = vmatpush1.bf16.msra.mxu1 %v4063_v25  ;;  %v3377_v25 = vcombine.low %v411_v19, %v415_v20 }
 0x151   : > { %1784 = vmatpush1.bf16.msra.mxu0 %v3977_v26  ;;  %v3359_v26 = vcombine.low %v394_v11, %v398_v12  ;;  %v395_v11 = vld [vmem:[%s4675_s21 + $0x118] sm:$0xff] }
 0x152   : > { %1785 = vmatprep.subr.bf16.mxu0 %v3982_v27  ;;  %v4064_v27 = vld [vmem:[#allocation7 + $0xa4] ss:$8 sps:$4 sm:$0xff]   ;;  %v399_v12 = vld [vmem:[%s4675_s21 + $0x138] sm:$0xff] }
 0x153   : > { %2230 = vmatprep.subr.bf16.mxu1 %v4064_v27 }
 0x154   : > { %1747 = vmatmul.mubr.bf16.gmra.mrb[28].mxu0 %v3381_v30  ;;  %v4015_v30 = vld [vmem:[#allocation5 + $0x394] ss:$8 sps:$4 sm:$0xff]  }
 0x155   : > { %1786 = vmatpush1.bf16.msra.mxu0 %v3980_v31  ;;  %1789 = vmatprep.mubr.bf16.mxu0 %v3328_v32  ;;  %v4066_v31 = vld [vmem:[#allocation7 + $0xa0] ss:$8 sps:$4 sm:$0xff]   ;;  %v4067_v32 = vld [vmem:[#allocation7 + $0xb4] ss:$8 sps:$4 sm:$0xff]  }
 0x156   : > { %1787 = vmatprep.subr.bf16.mxu0 %v3985_v33  ;;  %v4013_v33 = vld [vmem:[#allocation5 + $0x390] ss:$8 sps:$4 sm:$0xff]   ;;  %2231 = vmatpush1.bf16.msra.mxu1 %v4066_v31 }
 0x157   : > { %2232 = vmatprep.subr.bf16.mxu1 %v4067_v32  ;;  %v4081_v31 = vld [vmem:[#allocation7 + $0xf0] ss:$8 sps:$4 sm:$0xff]   ;;  %v4084_v32 = vld [vmem:[#allocation8 + $0x4] ss:$8 sps:$4 sm:$0xff]  }
 0x159   : > { %1788 = vmatpush1.bf16.msra.mxu0 %v3983_v37  ;;  %v4069_v37 = vld [vmem:[#allocation7 + $0xb0] ss:$8 sps:$4 sm:$0xff]  }
 0x15a   : > { %1870 = vmatprep.subr.bf16.mxu0 %v3988_v38  ;;  %v3367_v38 = vcombine.low %v402_v23, %v406_v24  ;;  %2233 = vmatpush1.bf16.msra.mxu1 %v4069_v37  ;;  %v419_v23 = vld [vmem:[%s4675_s21 + $0x1d8] sm:$0xff] }
 0x15b   : > { %2234 = vmatprep.subr.bf16.mxu1 %v4070_v39  ;;  %v423_v24 = vld [vmem:[%s4675_s21 + $0x1f8] sm:$0xff] }
 0x15c   : > { %1790 = vmatmul.mubr.bf16.vlgmr.msra.gmra.mrb[0].mxu0 %v3327_v42  ;;  %v4021_v42 = vld [vmem:[#allocation5 + $0x3b4] ss:$8 sps:$4 sm:$0xff]   ;;  %v3385_v27 = vcombine.low %v419_v23, %v423_v24 }
 0x15d   : > { %1871 = vmatpush1.bf16.msra.mxu0 %v3986_v44  ;;  %1799 = vmatprep.mubr.bf16.mxu0 %v3336_v45  ;;  %v4073_v44 = vld [vmem:[#allocation7 + $0xd4] ss:$8 sps:$4 sm:$0xff]   ;;  %v4019_v45 = vld [vmem:[#allocation5 + $0x3b0] ss:$8 sps:$4 sm:$0xff]  }
 0x15e   : > { %1872 = vmatprep.subr.bf16.mxu0 %v3991_v46  ;;  %v4024_v46 = vld [vmem:[#allocation5 + $0x3c4] ss:$8 sps:$4 sm:$0xff]   ;;  %2235 = vmatpush1.bf16.msra.mxu1 %v4072_v43 }
 0x15f   : > { %2236 = vmatprep.subr.bf16.mxu1 %v4073_v44 }
 0x161   : > { %1873 = vmatpush1.bf16.msra.mxu0 %v3989_v49  ;;  %v4075_v49 = vld [vmem:[#allocation7 + $0xd0] ss:$8 sps:$4 sm:$0xff]  }
 0x162   : > { %1874 = vmatprep.subr.bf16.mxu0 %v3994_v50  ;;  %v3375_v50 = vcombine.low %v410_v35, %v414_v36  ;;  %2237 = vmatpush1.bf16.msra.mxu1 %v4075_v49  ;;  %v4759_v36 = vld [vmem:[%s5203_s5] sm:$0x77] }
 0x164   : > { %1800 = vmatmul.mubr.bf16.gmra.mrb[4].mxu0 %v3335_v54  ;;  %v4025_v54 = vld [vmem:[#allocation5 + $0x3d0] ss:$8 sps:$4 sm:$0xff]  }
 0x165   : > { %1875 = vmatpush1.bf16.msra.mxu0 %v3992_v56  ;;  %1809 = vmatprep.mubr.bf16.mxu0 %v3344_v57  ;;  %v363_v56 = vld [vmem:[%s4675_s21 + $0x18] sm:$0xff] }
 0x166   : > { %1876 = vmatprep.subr.bf16.mxu0 %v3997_v58  ;;  %v367_v57 = vld [vmem:[%s4675_s21 + $0x38] sm:$0xff]  ;;  %v3383_v58 = vcombine.low %v418_v47, %v422_v48 }
 0x167   : > { %v3330_v60 = vcombine.high %v363_v56, %v367_v57  ;;  %v3329_v1 = vcombine.low %v363_v56, %v367_v57  ;;  %v4085_v57 = vld [vmem:[#allocation8 + $0x10] ss:$8 sps:$4 sm:$0xff]  }
 0x169   : > { %1877 = vmatpush1.bf16.msra.mxu0 %v3995_v61  ;;  %v4033_v61 = vld [vmem:[#allocation5 + $0x3f4] ss:$8 sps:$4 sm:$0xff]  }
 0x16a   : > { %1878 = vmatprep.subr.bf16.mxu0 %v4000_v62  ;;  %v4031_v62 = vld [vmem:[#allocation5 + $0x3f0] ss:$8 sps:$4 sm:$0xff]  }
 0x16c   : > { %1810 = vmatmul.mubr.bf16.gmra.mrb[8].mxu0 %v3343_v2  ;;  %v3338_v2 = vcombine.high %v371_v63, %v375_v0 }
 0x16d   : > { %1879 = vmatpush1.bf16.msra.mxu0 %v3998_v4  ;;  %1819 = vmatprep.mubr.bf16.mxu0 %v3352_v5  ;;  %v383_v4 = vld [vmem:[%s4675_s21 + $0xb8] sm:$0xff]  ;;  %v3337_v5 = vcombine.low %v371_v63, %v375_v0 }
 0x16e   : > { %1880 = vmatprep.subr.bf16.mxu0 %v4003_v6  ;;  %v3346_v6 = vcombine.high %v379_v3, %v383_v4 }
 0x171   : > { %1881 = vmatpush1.bf16.msra.mxu0 %v4001_v9  ;;  %v3345_v9 = vcombine.low %v379_v3, %v383_v4  ;;  %v4093_v3 = vld [vmem:[#allocation8 + $0x34] ss:$8 sps:$4 sm:$0xff]  }
 0x172   : > { %1882 = vmatprep.subr.bf16.mxu0 %v4006_v10  ;;  %v3354_v10 = vcombine.high %v387_v7, %v391_v8  ;;  %v4091_v7 = vld [vmem:[#allocation8 + $0x30] ss:$8 sps:$4 sm:$0xff]  }
 0x174   : > { %1820 = vmatmul.mubr.bf16.gmra.mrb[12].mxu0 %v3351_v14  ;;  %v3362_v14 = vcombine.high %v395_v11, %v399_v12 }
 0x175   : > { %1883 = vmatpush1.bf16.msra.mxu0 %v4004_v16  ;;  %1829 = vmatprep.mubr.bf16.mxu0 %v3360_v17  ;;  %v407_v16 = vld [vmem:[%s4675_s21 + $0x178] sm:$0xff]  ;;  %v3361_v17 = vcombine.low %v395_v11, %v399_v12  ;;  %s4324_s21 = sshll.u32 %s4405_s15, 4  ;;  %s4325_s21 = int_to_ptr.vmem [resolvable:$false] %s4324_s21 }
 0x176   : > { %1884 = vmatprep.subr.bf16.mxu0 %v4009_v18  ;;  %v3370_v18 = vcombine.high %v403_v15, %v407_v16  ;;  %s4326_s30 = scalar_lea.vmem %s4325_s21, 8192  ;;  %p4327_p12 = scmp.lt.s32.totalorder %s5150_s10, %s4325_s21 }
 0x177   : > { %p4328_p1 = scmp.lt.s32.totalorder %s4326_s30, %s4320_s13 }
 0x179   : > { %1885 = vmatpush1.bf16.msra.mxu0 %v4007_v21  ;;  %v3369_v21 = vcombine.low %v403_v15, %v407_v16  ;;  %v4094_v15 = vld [vmem:[#allocation8 + $0x40] ss:$8 sps:$4 sm:$0xff]   ;;  %p4329_p2 = por %p4328_p1, %p4327_p12 }
 0x17a   : > { %1886 = vmatprep.subr.bf16.mxu0 %v4012_v22  ;;  %v3378_v22 = vcombine.high %v411_v19, %v415_v20 }
 0x17b   : > { %p4330_p13 = pnand %p4329_p2, %p4323_p7 }
 0x17c   : > { %1830 = vmatmul.mubr.bf16.gmra.mrb[16].mxu0 %v3359_v26  ;;  %v3386_v26 = vcombine.high %v419_v23, %v423_v24  ;;  %v4102_v24 = vld [vmem:[#allocation8 + $0x64] ss:$8 sps:$4 sm:$0xff]  }
 0x17d   : > { %1887 = vmatpush1.bf16.msra.mxu0 %v4010_v28  ;;  %1839 = vmatprep.mubr.bf16.mxu0 %v3368_v29  ;;  %v4076_v28 = vld [vmem:[#allocation7 + $0xe4] ss:$8 sps:$4 sm:$0xff]   ;;  %v4078_v29 = vld [vmem:[#allocation7 + $0xe0] ss:$8 sps:$4 sm:$0xff]  }
 0x17e   : > { %1888 = vmatprep.subr.bf16.mxu0 %v4015_v30  ;;  %2238 = vmatprep.subr.bf16.mxu1 %v4076_v28  ;;  %v4079_v30 = vld [vmem:[#allocation7 + $0xf4] ss:$8 sps:$4 sm:$0xff]  }
 0x17f   : > { %2239 = vmatpush1.bf16.msra.mxu1 %v4078_v29  ;;  %v4100_v29 = vld [vmem:[#allocation8 + $0x60] ss:$8 sps:$4 sm:$0xff]  }
 0x180   : > { %2240 = vmatprep.subr.bf16.mxu1 %v4079_v30 }
 0x181   : > { %1889 = vmatpush1.bf16.msra.mxu0 %v4013_v33  ;;  %v553_v33 = vlaneseq }
 0x182   : > { %1890 = vmatprep.subr.bf16.mxu0 %v4018_v34 }
 0x183   : > { %2241 = vmatpush1.bf16.msra.mxu1 %v4081_v31  ;;  %v4753_v34 = vshrl.u32 %v553_v33, 7  ;;  %v4105_v31 = vld [vmem:[#allocation8 + $0x74] ss:$8 sps:$4 sm:$0xff]  }
 0x184   : > { %1840 = vmatmul.mubr.bf16.gmra.mrb[20].mxu0 %v3367_v38  ;;  %2581 = vmatprep.subr.bf16.mxu1 %v4084_v32 }
 0x185   : > { %1891 = vmatpush1.bf16.msra.mxu0 %v4016_v40  ;;  %1849 = vmatprep.mubr.bf16.mxu0 %v3376_v41  ;;  %v559_v35 = vsub.s32 4, %v4753_v34  ;;  %v4762_v37 = vsub.s32 0, %v4753_v34 }
 0x186   : > { %1892 = vmatprep.subr.bf16.mxu0 %v4021_v42 }
 0x187   : > { %v560_v38 = vrot.slane %v4759_v36, %v559_v35  ;;  %v556_v39 = vrot.slane %v4759_v36, %v4762_v37 }
 0x189   : > { %1893 = vmatpush1.bf16.msra.mxu0 %v4019_v45  ;;  %v4768_v41 = vrot.slane %v560_v38, %v4762_v37  ;;  %v4771_v42 = vrot.slane %v556_v39, %v4762_v37  ;;  %v4103_v38 = vld [vmem:[#allocation8 + $0x70] ss:$8 sps:$4 sm:$0xff]  }
 0x18a   : > { %1894 = vmatprep.subr.bf16.mxu0 %v4024_v46 }
 0x18c   : > { %1850 = vmatmul.mubr.bf16.gmra.mrb[24].mxu0 %v3375_v50 }
 0x18d   : > { %1895 = vmatpush1.bf16.msra.mxu0 %v4022_v51  ;;  %1859 = vmatprep.mubr.bf16.mxu0 %v3384_v52  ;;  %v4082_v51 = vld [vmem:[#allocation8] ss:$8 sps:$4 sm:$0xff]  }
 0x18e   : > { %1896 = vmatprep.subr.bf16.mxu0 %v4027_v53  ;;  %v4087_v53 = vld [vmem:[#allocation8 + $0x14] ss:$8 sps:$4 sm:$0xff]  }
 0x191   : > { %1897 = vmatpush1.bf16.msra.mxu0 %v4025_v54 }
 0x192   : > { %1898 = vmatprep.subr.bf16.mxu0 %v4030_v55 }
 0x194   : > { %1860 = vmatmul.mubr.bf16.gmra.mrb[28].mxu0 %v3383_v58 }
 0x195   : > { %1899 = vmatpush1.bf16.msra.mxu0 %v4028_v59  ;;  %1902 = vmatprep.mubr.bf16.mxu0 %v3330_v60  ;;  %v4090_v60 = vld [vmem:[#allocation8 + $0x24] ss:$8 sps:$4 sm:$0xff]  }
 0x196   : > { %1900 = vmatprep.subr.bf16.mxu0 %v4033_v61 }
 0x199   : > { %1901 = vmatpush1.bf16.msra.mxu0 %v4031_v62 }
 0x19c   : > { %1903 = vmatmul.mubr.bf16.vlgmr.msra.gmra.mrb[0].mxu0 %v3329_v1  ;;  %v4088_v1 = vld [vmem:[#allocation8 + $0x20] ss:$8 sps:$4 sm:$0xff]  }
 0x19d   : > { %1912 = vmatprep.mubr.bf16.mxu0 %v3338_v2 }
 0x1a4   : > { %1913 = vmatmul.mubr.bf16.gmra.mrb[4].mxu0 %v3337_v5 }
 0x1a5   : > { %1922 = vmatprep.mubr.bf16.mxu0 %v3346_v6 }
 0x1ac   : > { %1923 = vmatmul.mubr.bf16.gmra.mrb[8].mxu0 %v3345_v9 }
 0x1ad   : > { %1932 = vmatprep.mubr.bf16.mxu0 %v3354_v10  ;;  %v4096_v10 = vld [vmem:[#allocation8 + $0x44] ss:$8 sps:$4 sm:$0xff]  }
 0x1b4   : > { %1933 = vmatmul.mubr.bf16.gmra.mrb[12].mxu0 %v3353_v13 }
 0x1b5   : > { %1942 = vmatprep.mubr.bf16.mxu0 %v3362_v14 }
 0x1bc   : > { %1943 = vmatmul.mubr.bf16.gmra.mrb[16].mxu0 %v3361_v17  ;;  %v4099_v17 = vld [vmem:[#allocation8 + $0x54] ss:$8 sps:$4 sm:$0xff]  }
 0x1bd   : > { %1952 = vmatprep.mubr.bf16.mxu0 %v3370_v18 }
 0x1c4   : > { %1953 = vmatmul.mubr.bf16.gmra.mrb[20].mxu0 %v3369_v21  ;;  %v4097_v21 = vld [vmem:[#allocation8 + $0x50] ss:$8 sps:$4 sm:$0xff]  }
 0x1c5   : > { %1962 = vmatprep.mubr.bf16.mxu0 %v3378_v22 }
 0x1cc   : > { %1963 = vmatmul.mubr.bf16.gmra.mrb[24].mxu0 %v3377_v25 }
 0x1cd   : > { %1972 = vmatprep.mubr.bf16.mxu0 %v3386_v26 }
 0x1d4   : > { %1973 = vmatmul.mubr.bf16.gmra.mrb[28].mxu0 %v3385_v27 }
 0x26f   : > { %v1904_v40 = vpop.f32.mrb[0].mxu0 }
 0x270   : > { %v1906_v43 = vpop.f32.mrb[1].mxu0  ;;  %v4783_v49 = vadd.f32 %v1904_v40, %v4771_v42 }
 0x271   : > { %v1908_v44 = vpop.f32.mrb[2].mxu0  ;;  %v4777_v47 = vadd.f32 %v1906_v43, %v4768_v41  ;;  %v4108_v43 = vld [vmem:[#allocation8 + $0x84] ss:$8 sps:$4 sm:$0xff]  }
 0x272   : > { %v4774_v45 = vadd.f32 %v1908_v44, %v4771_v42  ;;  %v1910_v46 = vpop.f32.mrb[3].mxu0 }
 0x273   : > { %v4780_v48 = vadd.f32 %v1910_v46, %v4768_v41 }
 0x274   : > { %v1983_v52 = vpack.c.bf16 %v4774_v45, %v4783_v49 }
 0x275   : > { %v1984_v50 = vpack.c.bf16 %v4780_v48, %v4777_v47 }
 0x277   : > { %v1914_v54 = vpop.f32.mrb[4].mxu0  ;;  %2242 = vmatprep.mubr.bf16.mxu1 %v1984_v50 }
 0x278   : > { %v1916_v55 = vpop.f32.mrb[5].mxu0  ;;  %2243 = vmatmul.mubr.bf16.vlgmr.msra.gmra.mrb[0].mxu1 %v1983_v52  ;;  %v4799_v63 = vadd.f32 %v1914_v54, %v4771_v42  ;;  %v4106_v52 = vld [vmem:[#allocation8 + $0x80] ss:$8 sps:$4 sm:$0xff]   ;;  %v4111_v54 = vld [vmem:[#allocation8 + $0x94] ss:$8 sps:$4 sm:$0xff]  }
 0x279   : > { %v1918_v56 = vpop.f32.mrb[6].mxu0  ;;  %2582 = vmatpush1.bf16.msra.mxu1 %v4082_v51  ;;  %v4793_v61 = vadd.f32 %v1916_v55, %v4768_v41 }
 0x27a   : > { %v4790_v58 = vadd.f32 %v1918_v56, %v4771_v42  ;;  %v1920_v59 = vpop.f32.mrb[7].mxu0  ;;  %2583 = vmatprep.subr.bf16.mxu1 %v4087_v53 }
 0x27b   : > { %v4796_v62 = vadd.f32 %v1920_v59, %v4768_v41  ;;  %v4109_v59 = vld [vmem:[#allocation8 + $0x90] ss:$8 sps:$4 sm:$0xff]  }
 0x27c   : > { %v1985_v2 = vpack.c.bf16 %v4790_v58, %v4799_v63 }
 0x27d   : > { %v1986_v0 = vpack.c.bf16 %v4796_v62, %v4793_v61  ;;  %2584 = vmatpush1.bf16.msra.mxu1 %v4085_v57 }
 0x27e   : > { %2585 = vmatprep.subr.bf16.mxu1 %v4090_v60 }
 0x27f   : > { %v1924_v4 = vpop.f32.mrb[8].mxu0  ;;  %2252 = vmatprep.mubr.bf16.mxu1 %v1986_v0 }
 0x280   : > { %v1926_v5 = vpop.f32.mrb[9].mxu0  ;;  %2253 = vmatmul.mubr.bf16.gmra.mrb[4].mxu1 %v1985_v2  ;;  %v4815_v13 = vadd.f32 %v1924_v4, %v4771_v42 }
 0x281   : > { %v1928_v6 = vpop.f32.mrb[10].mxu0  ;;  %2586 = vmatpush1.bf16.msra.mxu1 %v4088_v1  ;;  %v4809_v11 = vadd.f32 %v1926_v5, %v4768_v41  ;;  %v4114_v1 = vld [vmem:[#allocation8 + $0xa4] ss:$8 sps:$4 sm:$0xff]  }
 0x282   : > { %v4806_v8 = vadd.f32 %v1928_v6, %v4771_v42  ;;  %v1930_v9 = vpop.f32.mrb[11].mxu0  ;;  %2587 = vmatprep.subr.bf16.mxu1 %v4093_v3  ;;  %v4112_v6 = vld [vmem:[#allocation8 + $0xa0] ss:$8 sps:$4 sm:$0xff]  }
 0x283   : > { %v4812_v12 = vadd.f32 %v1930_v9, %v4768_v41  ;;  %v4117_v9 = vld [vmem:[#allocation8 + $0xb4] ss:$8 sps:$4 sm:$0xff]  }
 0x284   : > { %v1987_v16 = vpack.c.bf16 %v4806_v8, %v4815_v13 }
 0x285   : > { %v1988_v14 = vpack.c.bf16 %v4812_v12, %v4809_v11  ;;  %2588 = vmatpush1.bf16.msra.mxu1 %v4091_v7 }
 0x286   : > { %2589 = vmatprep.subr.bf16.mxu1 %v4096_v10 }
 0x287   : > { %v1934_v18 = vpop.f32.mrb[12].mxu0  ;;  %2262 = vmatprep.mubr.bf16.mxu1 %v1988_v14 }
 0x288   : > { %v1936_v19 = vpop.f32.mrb[13].mxu0  ;;  %2263 = vmatmul.mubr.bf16.gmra.mrb[8].mxu1 %v1987_v16  ;;  %v4831_v27 = vadd.f32 %v1934_v18, %v4771_v42  ;;  %v4115_v16 = vld [vmem:[#allocation8 + $0xb0] ss:$8 sps:$4 sm:$0xff]  }
 0x289   : > { %v1938_v20 = vpop.f32.mrb[14].mxu0  ;;  %2590 = vmatpush1.bf16.msra.mxu1 %v4094_v15  ;;  %v4825_v25 = vadd.f32 %v1936_v19, %v4768_v41  ;;  %v4120_v19 = vld [vmem:[#allocation8 + $0xc4] ss:$8 sps:$4 sm:$0xff]  }
 0x28a   : > { %v4822_v22 = vadd.f32 %v1938_v20, %v4771_v42  ;;  %v1940_v23 = vpop.f32.mrb[15].mxu0  ;;  %2591 = vmatprep.subr.bf16.mxu1 %v4099_v17 }
 0x28b   : > { %v4828_v26 = vadd.f32 %v1940_v23, %v4768_v41 }
 0x28c   : > { %v1989_v30 = vpack.c.bf16 %v4822_v22, %v4831_v27 }
 0x28d   : > { %v1990_v28 = vpack.c.bf16 %v4828_v26, %v4825_v25  ;;  %2592 = vmatpush1.bf16.msra.mxu1 %v4097_v21 }
 0x28e   : > { %2593 = vmatprep.subr.bf16.mxu1 %v4102_v24 }
 0x28f   : > { %v1944_v32 = vpop.f32.mrb[16].mxu0  ;;  %2272 = vmatprep.mubr.bf16.mxu1 %v1990_v28  ;;  %v4118_v28 = vld [vmem:[#allocation8 + $0xc0] ss:$8 sps:$4 sm:$0xff]  }
 0x290   : > { %v1946_v33 = vpop.f32.mrb[17].mxu0  ;;  %2273 = vmatmul.mubr.bf16.gmra.mrb[12].mxu1 %v1989_v30  ;;  %v4847_v50 = vadd.f32 %v1944_v32, %v4771_v42  ;;  %v4123_v30 = vld [vmem:[#allocation8 + $0xd4] ss:$8 sps:$4 sm:$0xff]  }
 0x291   : > { %v1948_v35 = vpop.f32.mrb[18].mxu0  ;;  %2594 = vmatpush1.bf16.msra.mxu1 %v4100_v29  ;;  %v4841_v44 = vadd.f32 %v1946_v33, %v4768_v41 }
 0x292   : > { %v4838_v39 = vadd.f32 %v1948_v35, %v4771_v42  ;;  %v1950_v40 = vpop.f32.mrb[19].mxu0  ;;  %2595 = vmatprep.subr.bf16.mxu1 %v4105_v31  ;;  %v4121_v35 = vld [vmem:[#allocation8 + $0xd0] ss:$8 sps:$4 sm:$0xff]  }
 0x293   : > { %v4844_v46 = vadd.f32 %v1950_v40, %v4768_v41 }
 0x294   : > { %v1991_v53 = vpack.c.bf16 %v4838_v39, %v4847_v50 }
 0x295   : > { %v1992_v51 = vpack.c.bf16 %v4844_v46, %v4841_v44  ;;  %2596 = vmatpush1.bf16.msra.mxu1 %v4103_v38 }
 0x296   : > { %2597 = vmatprep.subr.bf16.mxu1 %v4108_v43 }
 0x297   : > { %v1954_v55 = vpop.f32.mrb[20].mxu0  ;;  %2282 = vmatprep.mubr.bf16.mxu1 %v1992_v51 }
 0x298   : > { %v1956_v56 = vpop.f32.mrb[21].mxu0  ;;  %2283 = vmatmul.mubr.bf16.gmra.mrb[16].mxu1 %v1991_v53  ;;  %v4863_v4 = vadd.f32 %v1954_v55, %v4771_v42  ;;  %v4126_v55 = vld [vmem:[#allocation8 + $0xe4] ss:$8 sps:$4 sm:$0xff]  }
 0x299   : > { %v1958_v57 = vpop.f32.mrb[22].mxu0  ;;  %2598 = vmatpush1.bf16.msra.mxu1 %v4106_v52  ;;  %v4857_v2 = vadd.f32 %v1956_v56, %v4768_v41  ;;  %v4124_v56 = vld [vmem:[#allocation8 + $0xe0] ss:$8 sps:$4 sm:$0xff]  }
 0x29a   : > { %v4854_v60 = vadd.f32 %v1958_v57, %v4771_v42  ;;  %v1960_v0 = vpop.f32.mrb[23].mxu0  ;;  %2599 = vmatprep.subr.bf16.mxu1 %v4111_v54  ;;  %v4129_v57 = vld [vmem:[#allocation8 + $0xf4] ss:$8 sps:$4 sm:$0xff]  }
 0x29b   : > { %v4860_v3 = vadd.f32 %v1960_v0, %v4768_v41  ;;  %v4907_v0 = vsub.s32 2, %v4753_v34 }
 0x29c   : > { %v1993_v7 = vpack.c.bf16 %v4854_v60, %v4863_v4 }
 0x29d   : > { %v1994_v5 = vpack.c.bf16 %v4860_v3, %v4857_v2  ;;  %2600 = vmatpush1.bf16.msra.mxu1 %v4109_v59  ;;  %v4127_v59 = vld [vmem:[#allocation8 + $0xf0] ss:$8 sps:$4 sm:$0xff]  }
 0x29e   : > { %2601 = vmatprep.subr.bf16.mxu1 %v4114_v1 }
 0x29f   : > { %v1964_v10 = vpop.f32.mrb[24].mxu0  ;;  %2292 = vmatprep.mubr.bf16.mxu1 %v1994_v5 }
 0x2a0   : > { %v1966_v14 = vpop.f32.mrb[25].mxu0  ;;  %2293 = vmatmul.mubr.bf16.gmra.mrb[20].mxu1 %v1993_v7  ;;  %v4879_v23 = vadd.f32 %v1964_v10, %v4771_v42 }
 0x2a1   : > { %v1968_v15 = vpop.f32.mrb[26].mxu0  ;;  %2602 = vmatpush1.bf16.msra.mxu1 %v4112_v6  ;;  %v4873_v20 = vadd.f32 %v1966_v14, %v4768_v41 }
 0x2a2   : > { %v4870_v17 = vadd.f32 %v1968_v15, %v4771_v42  ;;  %v1970_v18 = vpop.f32.mrb[27].mxu0  ;;  %2603 = vmatprep.subr.bf16.mxu1 %v4117_v9 }
 0x2a3   : > { %v4876_v21 = vadd.f32 %v1970_v18, %v4768_v41 }
 0x2a4   : > { %v1995_v29 = vpack.c.bf16 %v4870_v17, %v4879_v23 }
 0x2a5   : > { %v1996_v24 = vpack.c.bf16 %v4876_v21, %v4873_v20  ;;  %2604 = vmatpush1.bf16.msra.mxu1 %v4115_v16 }
 0x2a6   : > { %2605 = vmatprep.subr.bf16.mxu1 %v4120_v19 }
 0x2a7   : > { %v1974_v31 = vpop.f32.mrb[28].mxu0  ;;  %2302 = vmatprep.mubr.bf16.mxu1 %v1996_v24 }
 0x2a8   : > { %v1976_v32 = vpop.f32.mrb[29].mxu0  ;;  %2303 = vmatmul.mubr.bf16.gmra.mrb[24].mxu1 %v1995_v29  ;;  %v4895_v52 = vadd.f32 %v1974_v31, %v4771_v42 }
 0x2a9   : > { %v1978_v33 = vpop.f32.mrb[30].mxu0  ;;  %2606 = vmatpush1.bf16.msra.mxu1 %v4118_v28  ;;  %v4889_v43 = vadd.f32 %v1976_v32, %v4768_v41 }
 0x2aa   : > { %v4886_v38 = vadd.f32 %v1978_v33, %v4771_v42  ;;  %v1980_v40 = vpop.f32.mrb[31].mxu0  ;;  %2607 = vmatprep.subr.bf16.mxu1 %v4123_v30  ;;  %v4904_v42 = vld [vmem:[%s5204_s6] sm:$0xf] }
 0x2ab   : > { %v4892_v51 = vadd.f32 %v1980_v40, %v4768_v41  ;;  %v4132_v41 = vld [vmem:[#allocation10 + $0x4] ss:$8 sps:$4 sm:$0xff]   ;;  %v2035_v1 = vrot.slane %v4904_v42, %v4762_v37  ;;  %v2039_v5 = vrot.slane %v4904_v42, %v4907_v0 }
 0x2ac   : > { %v1997_v54 = vpack.c.bf16 %v4886_v38, %v4895_v52 }
 0x2ad   : > { %v1998_v53 = vpack.c.bf16 %v4892_v51, %v4889_v43  ;;  %2608 = vmatpush1.bf16.msra.mxu1 %v4121_v35  ;;  %v4914_v6 = vrot.slane %v2035_v1, %v4762_v37  ;;  %v4917_v7 = vrot.slane %v2039_v5, %v4762_v37  ;;  %v4130_v35 = vld [vmem:[#allocation10] ss:$8 sps:$4 sm:$0xff]   ;;  %v4133_v1 = vld [vmem:[#allocation10 + $0x10] ss:$8 sps:$4 sm:$0xff]  }
 0x2ae   : > { %2609 = vmatprep.subr.bf16.mxu1 %v4126_v55 }
 0x2af   : > { %2312 = vmatprep.mubr.bf16.mxu1 %v1998_v53 }
 0x2b0   : > { %2313 = vmatmul.mubr.bf16.gmra.mrb[28].mxu1 %v1997_v54  ;;  %v4135_v54 = vld [vmem:[#allocation10 + $0x14] ss:$8 sps:$4 sm:$0xff]  }
 0x2b1   : > { %2610 = vmatpush1.bf16.msra.mxu1 %v4124_v56 }
 0x2b2   : > { %2611 = vmatprep.subr.bf16.mxu1 %v4129_v57 }
 0x2b5   : > { %2612 = vmatpush1.bf16.msra.mxu1 %v4127_v59 }
 0x2b6   : > { %2952 = vmatprep.subr.bf16.mxu1 %v4132_v41 }
 0x34b   : > { %v2244_v9 = vpop.f32.mrb[0].mxu1 }
 0x34c   : > { %v2245_v10 = vadd.f32 %v2244_v9, %v4914_v6  ;;  %v2246_v14 = vpop.f32.mrb[1].mxu1 }
 0x34d   : > { %v2247_v15 = vadd.f32 %v2246_v14, %v4917_v7  ;;  %v2248_v16 = vpop.f32.mrb[2].mxu1 }
 0x34e   : > { %v2249_v18 = vadd.f32 %v2248_v16, %v4914_v6  ;;  %v2250_v19 = vpop.f32.mrb[3].mxu1  ;;  %v2323_v28 = vmax.f32 %v2245_v10, 0.0  ;;  %v4138_v10 = vld [vmem:[#allocation10 + $0x24] ss:$8 sps:$4 sm:$0xff]  }
 0x34f   : > { %v2251_v24 = vadd.f32 %v2250_v19, %v4917_v7  ;;  %v2324_v30 = vmax.f32 %v2247_v15, 0.0 }
 0x350   : > { %v2325_v29 = vmax.f32 %v2249_v18, 0.0 }
 0x351   : > { %v2326_v31 = vmax.f32 %v2251_v24, 0.0  ;;  %v4136_v24 = vld [vmem:[#allocation10 + $0x20] ss:$8 sps:$4 sm:$0xff]  }
 0x352   : > { %v2355_v32 = vpack.c.bf16 %v2325_v29, %v2323_v28 }
 0x353   : > { %v2356_v33 = vpack.c.bf16 %v2326_v31, %v2324_v30  ;;  %v2254_v37 = vpop.f32.mrb[4].mxu1  ;;  %v4141_v30 = vld [vmem:[#allocation10 + $0x34] ss:$8 sps:$4 sm:$0xff]  }
 0x354   : > { %v2255_v40 = vadd.f32 %v2254_v37, %v4914_v6  ;;  %v2256_v53 = vpop.f32.mrb[5].mxu1 }
 0x355   : > { %v2257_v55 = vadd.f32 %v2256_v53, %v4917_v7  ;;  %v2258_v56 = vpop.f32.mrb[6].mxu1  ;;  %2613 = vmatprep.mubr.bf16.mxu1 %v2356_v33 }
 0x356   : > { %v2259_v57 = vadd.f32 %v2258_v56, %v4914_v6  ;;  %v2260_v59 = vpop.f32.mrb[7].mxu1  ;;  %2614 = vmatmul.mubr.bf16.vlgmr.msra.gmra.mrb[32].mxu1 %v2355_v32  ;;  %v2327_v5 = vmax.f32 %v2255_v40, 0.0  ;;  %v4139_v40 = vld [vmem:[#allocation10 + $0x30] ss:$8 sps:$4 sm:$0xff]  }
 0x357   : > { %v2261_v41 = vadd.f32 %v2260_v59, %v4917_v7  ;;  %2953 = vmatpush1.bf16.msra.mxu1 %v4130_v35  ;;  %v2328_v14 = vmax.f32 %v2257_v55, 0.0  ;;  %v4144_v55 = vld [vmem:[#allocation10 + $0x44] ss:$8 sps:$4 sm:$0xff]  }
 0x358   : > { %v2329_v9 = vmax.f32 %v2259_v57, 0.0  ;;  %2954 = vmatprep.subr.bf16.mxu1 %v4135_v54 }
 0x359   : > { %v2330_v15 = vmax.f32 %v2261_v41, 0.0 }
 0x35a   : > { %v2357_v16 = vpack.c.bf16 %v2329_v9, %v2327_v5  ;;  %v4142_v5 = vld [vmem:[#allocation10 + $0x40] ss:$8 sps:$4 sm:$0xff]  }
 0x35b   : > { %v2358_v18 = vpack.c.bf16 %v2330_v15, %v2328_v14  ;;  %v2264_v19 = vpop.f32.mrb[8].mxu1  ;;  %2955 = vmatpush1.bf16.msra.mxu1 %v4133_v1  ;;  %v4147_v14 = vld [vmem:[#allocation10 + $0x54] ss:$8 sps:$4 sm:$0xff]  }
 0x35c   : > { %v2265_v28 = vadd.f32 %v2264_v19, %v4914_v6  ;;  %v2266_v29 = vpop.f32.mrb[9].mxu1  ;;  %2956 = vmatprep.subr.bf16.mxu1 %v4138_v10 }
 0x35d   : > { %v2267_v31 = vadd.f32 %v2266_v29, %v4917_v7  ;;  %v2268_v32 = vpop.f32.mrb[10].mxu1  ;;  %2623 = vmatprep.mubr.bf16.mxu1 %v2358_v18 }
 0x35e   : > { %v2269_v33 = vadd.f32 %v2268_v32, %v4914_v6  ;;  %v2270_v37 = vpop.f32.mrb[11].mxu1  ;;  %2624 = vmatmul.mubr.bf16.gmra.mrb[36].mxu1 %v2357_v16  ;;  %v2331_v53 = vmax.f32 %v2265_v28, 0.0  ;;  %v4145_v28 = vld [vmem:[#allocation10 + $0x50] ss:$8 sps:$4 sm:$0xff]  }
 0x35f   : > { %v2271_v35 = vadd.f32 %v2270_v37, %v4917_v7  ;;  %2957 = vmatpush1.bf16.msra.mxu1 %v4136_v24  ;;  %v2332_v56 = vmax.f32 %v2267_v31, 0.0  ;;  %v4150_v31 = vld [vmem:[#allocation10 + $0x64] ss:$8 sps:$4 sm:$0xff]  }
 0x360   : > { %v2333_v54 = vmax.f32 %v2269_v33, 0.0  ;;  %2958 = vmatprep.subr.bf16.mxu1 %v4141_v30 }
 0x361   : > { %v2334_v57 = vmax.f32 %v2271_v35, 0.0 }
 0x362   : > { %v2359_v59 = vpack.c.bf16 %v2333_v54, %v2331_v53  ;;  %v4148_v53 = vld [vmem:[#allocation10 + $0x60] ss:$8 sps:$4 sm:$0xff]  }
 0x363   : > { %v2360_v41 = vpack.c.bf16 %v2334_v57, %v2332_v56  ;;  %v2274_v1 = vpop.f32.mrb[12].mxu1  ;;  %2959 = vmatpush1.bf16.msra.mxu1 %v4139_v40  ;;  %v4153_v56 = vld [vmem:[#allocation10 + $0x74] ss:$8 sps:$4 sm:$0xff]  }
 0x364   : > { %v2275_v9 = vadd.f32 %v2274_v1, %v4914_v6  ;;  %v2276_v10 = vpop.f32.mrb[13].mxu1  ;;  %2960 = vmatprep.subr.bf16.mxu1 %v4144_v55 }
 0x365   : > { %v2277_v15 = vadd.f32 %v2276_v10, %v4917_v7  ;;  %v2278_v16 = vpop.f32.mrb[14].mxu1  ;;  %2633 = vmatprep.mubr.bf16.mxu1 %v2360_v41 }
 0x366   : > { %v2279_v18 = vadd.f32 %v2278_v16, %v4914_v6  ;;  %v2280_v19 = vpop.f32.mrb[15].mxu1  ;;  %2634 = vmatmul.mubr.bf16.gmra.mrb[40].mxu1 %v2359_v59  ;;  %v2335_v29 = vmax.f32 %v2275_v9, 0.0  ;;  %v4151_v9 = vld [vmem:[#allocation10 + $0x70] ss:$8 sps:$4 sm:$0xff]  }
 0x367   : > { %v2281_v24 = vadd.f32 %v2280_v19, %v4917_v7  ;;  %2961 = vmatpush1.bf16.msra.mxu1 %v4142_v5  ;;  %v2336_v32 = vmax.f32 %v2277_v15, 0.0  ;;  %v4156_v15 = vld [vmem:[#allocation10 + $0x84] ss:$8 sps:$4 sm:$0xff]  }
 0x368   : > { %v2337_v30 = vmax.f32 %v2279_v18, 0.0  ;;  %2962 = vmatprep.subr.bf16.mxu1 %v4147_v14 }
 0x369   : > { %v2338_v33 = vmax.f32 %v2281_v24, 0.0 }
 0x36a   : > { %v2361_v37 = vpack.c.bf16 %v2337_v30, %v2335_v29  ;;  %v4154_v29 = vld [vmem:[#allocation10 + $0x80] ss:$8 sps:$4 sm:$0xff]  }
 0x36b   : > { %v2362_v35 = vpack.c.bf16 %v2338_v33, %v2336_v32  ;;  %v2284_v40 = vpop.f32.mrb[16].mxu1  ;;  %2963 = vmatpush1.bf16.msra.mxu1 %v4145_v28  ;;  %v4159_v32 = vld [vmem:[#allocation10 + $0x94] ss:$8 sps:$4 sm:$0xff]  }
 0x36c   : > { %v2285_v54 = vadd.f32 %v2284_v40, %v4914_v6  ;;  %v2286_v55 = vpop.f32.mrb[17].mxu1  ;;  %2964 = vmatprep.subr.bf16.mxu1 %v4150_v31 }
 0x36d   : > { %v2287_v57 = vadd.f32 %v2286_v55, %v4917_v7  ;;  %v2288_v59 = vpop.f32.mrb[18].mxu1  ;;  %2643 = vmatprep.mubr.bf16.mxu1 %v2362_v35 }
 0x36e   : > { %v2289_v41 = vadd.f32 %v2288_v59, %v4914_v6  ;;  %v2290_v1 = vpop.f32.mrb[19].mxu1  ;;  %2644 = vmatmul.mubr.bf16.gmra.mrb[44].mxu1 %v2361_v37  ;;  %v2339_v10 = vmax.f32 %v2285_v54, 0.0  ;;  %v4157_v54 = vld [vmem:[#allocation10 + $0x90] ss:$8 sps:$4 sm:$0xff]  }
 0x36f   : > { %v2291_v5 = vadd.f32 %v2290_v1, %v4917_v7  ;;  %2965 = vmatpush1.bf16.msra.mxu1 %v4148_v53  ;;  %v2340_v16 = vmax.f32 %v2287_v57, 0.0  ;;  %v4162_v57 = vld [vmem:[#allocation10 + $0xa4] ss:$8 sps:$4 sm:$0xff]  }
 0x370   : > { %v2341_v14 = vmax.f32 %v2289_v41, 0.0  ;;  %2966 = vmatprep.subr.bf16.mxu1 %v4153_v56 }
 0x371   : > { %v2342_v18 = vmax.f32 %v2291_v5, 0.0 }
 0x372   : > { %v2363_v19 = vpack.c.bf16 %v2341_v14, %v2339_v10  ;;  %v4160_v10 = vld [vmem:[#allocation10 + $0xa0] ss:$8 sps:$4 sm:$0xff]  }
 0x373   : > { %v2364_v24 = vpack.c.bf16 %v2342_v18, %v2340_v16  ;;  %v2294_v28 = vpop.f32.mrb[20].mxu1  ;;  %2967 = vmatpush1.bf16.msra.mxu1 %v4151_v9  ;;  %v4165_v16 = vld [vmem:[#allocation10 + $0xb4] ss:$8 sps:$4 sm:$0xff]  }
 0x374   : > { %v2295_v30 = vadd.f32 %v2294_v28, %v4914_v6  ;;  %v2296_v31 = vpop.f32.mrb[21].mxu1  ;;  %2968 = vmatprep.subr.bf16.mxu1 %v4156_v15 }
 0x375   : > { %v2297_v33 = vadd.f32 %v2296_v31, %v4917_v7  ;;  %v2298_v37 = vpop.f32.mrb[22].mxu1  ;;  %2653 = vmatprep.mubr.bf16.mxu1 %v2364_v24 }
 0x376   : > { %v2299_v35 = vadd.f32 %v2298_v37, %v4914_v6  ;;  %v2300_v40 = vpop.f32.mrb[23].mxu1  ;;  %2654 = vmatmul.mubr.bf16.gmra.mrb[48].mxu1 %v2363_v19  ;;  %v2343_v55 = vmax.f32 %v2295_v30, 0.0  ;;  %v4163_v30 = vld [vmem:[#allocation10 + $0xb0] ss:$8 sps:$4 sm:$0xff]  }
 0x377   : > { %v2301_v53 = vadd.f32 %v2300_v40, %v4917_v7  ;;  %2969 = vmatpush1.bf16.msra.mxu1 %v4154_v29  ;;  %v2344_v59 = vmax.f32 %v2297_v33, 0.0  ;;  %v4168_v33 = vld [vmem:[#allocation10 + $0xc4] ss:$8 sps:$4 sm:$0xff]  }
 0x378   : > { %v2345_v56 = vmax.f32 %v2299_v35, 0.0  ;;  %2970 = vmatprep.subr.bf16.mxu1 %v4159_v32 }
 0x379   : > { %v2346_v41 = vmax.f32 %v2301_v53, 0.0 }
 0x37a   : > { %v2365_v1 = vpack.c.bf16 %v2345_v56, %v2343_v55  ;;  %v4166_v55 = vld [vmem:[#allocation10 + $0xc0] ss:$8 sps:$4 sm:$0xff]  }
 0x37b   : > { %v2366_v5 = vpack.c.bf16 %v2346_v41, %v2344_v59  ;;  %v2304_v9 = vpop.f32.mrb[24].mxu1  ;;  %2971 = vmatpush1.bf16.msra.mxu1 %v4157_v54  ;;  %v4171_v59 = vld [vmem:[#allocation10 + $0xd4] ss:$8 sps:$4 sm:$0xff]  }
 0x37c   : > { %v2305_v14 = vadd.f32 %v2304_v9, %v4914_v6  ;;  %v2306_v15 = vpop.f32.mrb[25].mxu1  ;;  %2972 = vmatprep.subr.bf16.mxu1 %v4162_v57 }
 0x37d   : > { %v2307_v18 = vadd.f32 %v2306_v15, %v4917_v7  ;;  %v2308_v19 = vpop.f32.mrb[26].mxu1  ;;  %2663 = vmatprep.mubr.bf16.mxu1 %v2366_v5 }
 0x37e   : > { %v2309_v24 = vadd.f32 %v2308_v19, %v4914_v6  ;;  %v2310_v28 = vpop.f32.mrb[27].mxu1  ;;  %2664 = vmatmul.mubr.bf16.gmra.mrb[52].mxu1 %v2365_v1  ;;  %v2347_v31 = vmax.f32 %v2305_v14, 0.0  ;;  %v4169_v14 = vld [vmem:[#allocation10 + $0xd0] ss:$8 sps:$4 sm:$0xff]  }
 0x37f   : > { %v2311_v29 = vadd.f32 %v2310_v28, %v4917_v7  ;;  %2973 = vmatpush1.bf16.msra.mxu1 %v4160_v10  ;;  %v2348_v37 = vmax.f32 %v2307_v18, 0.0 }
 0x380   : > { %v2349_v32 = vmax.f32 %v2309_v24, 0.0  ;;  %2974 = vmatprep.subr.bf16.mxu1 %v4165_v16 }
 0x381   : > { %v2350_v35 = vmax.f32 %v2311_v29, 0.0  ;;  %v4174_v29 = vld [vmem:[#allocation10 + $0xe4] ss:$8 sps:$4 sm:$0xff]  }
 0x382   : > { %v2367_v40 = vpack.c.bf16 %v2349_v32, %v2347_v31  ;;  %v4175_v31 = vld [vmem:[#allocation10 + $0xf0] ss:$8 sps:$4 sm:$0xff]   ;;  %v2409_v32 = vsub.s32 3, %v4753_v34 }
 0x383   : > { %v2368_v53 = vpack.c.bf16 %v2350_v35, %v2348_v37  ;;  %v2314_v54 = vpop.f32.mrb[28].mxu1  ;;  %2975 = vmatpush1.bf16.msra.mxu1 %v4163_v30  ;;  %v4172_v30 = vld [vmem:[#allocation10 + $0xe0] ss:$8 sps:$4 sm:$0xff]  }
 0x384   : > { %v2315_v56 = vadd.f32 %v2314_v54, %v4914_v6  ;;  %v2316_v57 = vpop.f32.mrb[29].mxu1  ;;  %2976 = vmatprep.subr.bf16.mxu1 %v4168_v33  ;;  %v2410_v37 = vrot.slane %v4904_v42, %v2409_v32 }
 0x385   : > { %v2317_v41 = vadd.f32 %v2316_v57, %v4917_v7  ;;  %v2318_v1 = vpop.f32.mrb[30].mxu1  ;;  %2673 = vmatprep.mubr.bf16.mxu1 %v2368_v53 }
 0x386   : > { %v2319_v5 = vadd.f32 %v2318_v1, %v4914_v6  ;;  %v2320_v9 = vpop.f32.mrb[31].mxu1  ;;  %2674 = vmatmul.mubr.bf16.gmra.mrb[56].mxu1 %v2367_v40  ;;  %v2351_v15 = vmax.f32 %v2315_v56, 0.0  ;;  %v4177_v6 = vld [vmem:[#allocation10 + $0xf4] ss:$8 sps:$4 sm:$0xff]  }
 0x387   : > { %v2321_v10 = vadd.f32 %v2320_v9, %v4917_v7  ;;  %2977 = vmatpush1.bf16.msra.mxu1 %v4166_v55  ;;  %v2352_v18 = vmax.f32 %v2317_v41, 0.0  ;;  %v4952_v7 = vsub.s32 1, %v4753_v34 }
 0x388   : > { %v2353_v16 = vmax.f32 %v2319_v5, 0.0  ;;  %2978 = vmatprep.subr.bf16.mxu1 %v4171_v59 }
 0x389   : > { %v2354_v19 = vmax.f32 %v2321_v10, 0.0  ;;  %v2406_v33 = vrot.slane %v4904_v42, %v4952_v7  ;;  %v4962_v40 = vrot.slane %v2410_v37, %v4952_v7 }
 0x38a   : > { %v2369_v24 = vpack.c.bf16 %v2353_v16, %v2351_v15 }
 0x38b   : > { %v2370_v28 = vpack.c.bf16 %v2354_v19, %v2352_v18  ;;  %2979 = vmatpush1.bf16.msra.mxu1 %v4169_v14  ;;  %v4959_v35 = vrot.slane %v2406_v33, %v4952_v7 }
 0x38c   : > { %2980 = vmatprep.subr.bf16.mxu1 %v4174_v29 }
 0x38d   : > { %2683 = vmatprep.mubr.bf16.mxu1 %v2370_v28 }
 0x38e   : > { %2684 = vmatmul.mubr.bf16.gmra.mrb[60].mxu1 %v2369_v24 }
 0x38f   : > { %2981 = vmatpush1.bf16.msra.mxu1 %v4172_v30 }
 0x390   : > { %2982 = vmatprep.subr.bf16.mxu1 %v4177_v6 }
 0x393   : > { %2983 = vmatpush1.bf16.msra.mxu1 %v4175_v31 }
 0x429   : > { %v2615_v53 = vpop.f32.mrb[32].mxu1 }
 0x42a   : > { %v2616_v54 = vadd.f32 %v2615_v53, %v4959_v35  ;;  %v2617_v55 = vpop.f32.mrb[33].mxu1 }
 0x42b   : > { %v2618_v56 = vadd.f32 %v2617_v55, %v4962_v40  ;;  %v2619_v57 = vpop.f32.mrb[34].mxu1 }
 0x42c   : > { %v2620_v59 = vadd.f32 %v2619_v57, %v4959_v35  ;;  %v2621_v41 = vpop.f32.mrb[35].mxu1  ;;  %v2694_v5 = vmax.f32 %v2616_v54, 0.0 }
 0x42d   : > { %v2622_v1 = vadd.f32 %v2621_v41, %v4962_v40  ;;  %v2695_v9 = vmax.f32 %v2618_v56, 0.0 }
 0x42e   : > { %v2696_v42 = vmax.f32 %v2620_v59, 0.0 }
 0x42f   : > { %v2697_v10 = vmax.f32 %v2622_v1, 0.0 }
 0x430   : > { %v2726_v14 = vpack.c.bf16 %v2696_v42, %v2694_v5 }
 0x431   : > { %v2727_v15 = vpack.c.bf16 %v2697_v10, %v2695_v9  ;;  %v2625_v16 = vpop.f32.mrb[36].mxu1 }
 0x432   : > { %v2626_v18 = vadd.f32 %v2625_v16, %v4959_v35  ;;  %v2627_v19 = vpop.f32.mrb[37].mxu1 }
 0x433   : > { %v2628_v24 = vadd.f32 %v2627_v19, %v4962_v40  ;;  %v2629_v28 = vpop.f32.mrb[38].mxu1  ;;  %2984 = vmatprep.mubr.bf16.mxu1 %v2727_v15 }
 0x434   : > { %v2630_v29 = vadd.f32 %v2629_v28, %v4959_v35  ;;  %v2631_v30 = vpop.f32.mrb[39].mxu1  ;;  %2985 = vmatmul.mubr.bf16.vlgmr.msra.gmra.mrb[64].mxu1 %v2726_v14  ;;  %v2698_v31 = vmax.f32 %v2626_v18, 0.0 }
 0x435   : > { %v2632_v6 = vadd.f32 %v2631_v30, %v4962_v40  ;;  %v2699_v33 = vmax.f32 %v2628_v24, 0.0 }
 0x436   : > { %v2700_v32 = vmax.f32 %v2630_v29, 0.0 }
 0x437   : > { %v2701_v37 = vmax.f32 %v2632_v6, 0.0 }
 0x438   : > { %v2728_v53 = vpack.c.bf16 %v2700_v32, %v2698_v31 }
 0x439   : > { %v2729_v54 = vpack.c.bf16 %v2701_v37, %v2699_v33  ;;  %v2635_v55 = vpop.f32.mrb[40].mxu1 }
 0x43a   : > { %v2636_v56 = vadd.f32 %v2635_v55, %v4959_v35  ;;  %v2637_v57 = vpop.f32.mrb[41].mxu1 }
 0x43b   : > { %v2638_v59 = vadd.f32 %v2637_v57, %v4962_v40  ;;  %v2639_v41 = vpop.f32.mrb[42].mxu1  ;;  %2994 = vmatprep.mubr.bf16.mxu1 %v2729_v54 }
 0x43c   : > { %v2640_v1 = vadd.f32 %v2639_v41, %v4959_v35  ;;  %v2641_v5 = vpop.f32.mrb[43].mxu1  ;;  %2995 = vmatmul.mubr.bf16.gmra.mrb[68].mxu1 %v2728_v53  ;;  %v2702_v9 = vmax.f32 %v2636_v56, 0.0 }
 0x43d   : > { %v2642_v42 = vadd.f32 %v2641_v5, %v4962_v40  ;;  %v2703_v14 = vmax.f32 %v2638_v59, 0.0 }
 0x43e   : > { %v2704_v10 = vmax.f32 %v2640_v1, 0.0 }
 0x43f   : > { %v2705_v15 = vmax.f32 %v2642_v42, 0.0 }
 0x440   : > { %v2730_v16 = vpack.c.bf16 %v2704_v10, %v2702_v9 }
 0x441   : > { %v2731_v18 = vpack.c.bf16 %v2705_v15, %v2703_v14  ;;  %v2645_v19 = vpop.f32.mrb[44].mxu1 }
 0x442   : > { %v2646_v24 = vadd.f32 %v2645_v19, %v4959_v35  ;;  %v2647_v28 = vpop.f32.mrb[45].mxu1 }
 0x443   : > { %v2648_v29 = vadd.f32 %v2647_v28, %v4962_v40  ;;  %v2649_v30 = vpop.f32.mrb[46].mxu1  ;;  %3004 = vmatprep.mubr.bf16.mxu1 %v2731_v18 }
 0x444   : > { %v2650_v6 = vadd.f32 %v2649_v30, %v4959_v35  ;;  %v2651_v31 = vpop.f32.mrb[47].mxu1  ;;  %3005 = vmatmul.mubr.bf16.gmra.mrb[72].mxu1 %v2730_v16  ;;  %v2706_v33 = vmax.f32 %v2646_v24, 0.0 }
 0x445   : > { %v2652_v32 = vadd.f32 %v2651_v31, %v4962_v40  ;;  %v2707_v53 = vmax.f32 %v2648_v29, 0.0 }
 0x446   : > { %v2708_v37 = vmax.f32 %v2650_v6, 0.0 }
 0x447   : > { %v2709_v54 = vmax.f32 %v2652_v32, 0.0 }
 0x448   : > { %v2732_v55 = vpack.c.bf16 %v2708_v37, %v2706_v33 }
 0x449   : > { %v2733_v56 = vpack.c.bf16 %v2709_v54, %v2707_v53  ;;  %v2655_v57 = vpop.f32.mrb[48].mxu1 }
 0x44a   : > { %v2656_v59 = vadd.f32 %v2655_v57, %v4959_v35  ;;  %v2657_v41 = vpop.f32.mrb[49].mxu1 }
 0x44b   : > { %v2658_v1 = vadd.f32 %v2657_v41, %v4962_v40  ;;  %v2659_v5 = vpop.f32.mrb[50].mxu1  ;;  %3014 = vmatprep.mubr.bf16.mxu1 %v2733_v56 }
 0x44c   : > { %v2660_v42 = vadd.f32 %v2659_v5, %v4959_v35  ;;  %v2661_v9 = vpop.f32.mrb[51].mxu1  ;;  %3015 = vmatmul.mubr.bf16.gmra.mrb[76].mxu1 %v2732_v55  ;;  %v2710_v14 = vmax.f32 %v2656_v59, 0.0 }
 0x44d   : > { %v2662_v10 = vadd.f32 %v2661_v9, %v4962_v40  ;;  %v2711_v16 = vmax.f32 %v2658_v1, 0.0 }
 0x44e   : > { %v2712_v15 = vmax.f32 %v2660_v42, 0.0 }
 0x44f   : > { %v2713_v18 = vmax.f32 %v2662_v10, 0.0 }
 0x450   : > { %v2734_v19 = vpack.c.bf16 %v2712_v15, %v2710_v14 }
 0x451   : > { %v2735_v24 = vpack.c.bf16 %v2713_v18, %v2711_v16  ;;  %v2665_v28 = vpop.f32.mrb[52].mxu1 }
 0x452   : > { %v2666_v29 = vadd.f32 %v2665_v28, %v4959_v35  ;;  %v2667_v30 = vpop.f32.mrb[53].mxu1 }
 0x453   : > { %v2668_v6 = vadd.f32 %v2667_v30, %v4962_v40  ;;  %v2669_v31 = vpop.f32.mrb[54].mxu1  ;;  %3024 = vmatprep.mubr.bf16.mxu1 %v2735_v24 }
 0x454   : > { %v2670_v32 = vadd.f32 %v2669_v31, %v4959_v35  ;;  %v2671_v33 = vpop.f32.mrb[55].mxu1  ;;  %3025 = vmatmul.mubr.bf16.gmra.mrb[80].mxu1 %v2734_v19  ;;  %v2714_v53 = vmax.f32 %v2666_v29, 0.0 }
 0x455   : > { %v2672_v37 = vadd.f32 %v2671_v33, %v4962_v40  ;;  %v2715_v55 = vmax.f32 %v2668_v6, 0.0 }
 0x456   : > { %v2716_v54 = vmax.f32 %v2670_v32, 0.0 }
 0x457   : > { %v2717_v56 = vmax.f32 %v2672_v37, 0.0 }
 0x458   : > { %v2736_v57 = vpack.c.bf16 %v2716_v54, %v2714_v53 }
 0x459   : > { %v2737_v59 = vpack.c.bf16 %v2717_v56, %v2715_v55  ;;  %v2675_v41 = vpop.f32.mrb[56].mxu1 }
 0x45a   : > { %v2676_v1 = vadd.f32 %v2675_v41, %v4959_v35  ;;  %v2677_v5 = vpop.f32.mrb[57].mxu1 }
 0x45b   : > { %v2678_v42 = vadd.f32 %v2677_v5, %v4962_v40  ;;  %v2679_v9 = vpop.f32.mrb[58].mxu1  ;;  %3034 = vmatprep.mubr.bf16.mxu1 %v2737_v59  ;;  %v2780_v5 = vsub.s32 5, %v4753_v34 }
 0x45c   : > { %v2680_v10 = vadd.f32 %v2679_v9, %v4959_v35  ;;  %v2681_v14 = vpop.f32.mrb[59].mxu1  ;;  %3035 = vmatmul.mubr.bf16.gmra.mrb[84].mxu1 %v2736_v57  ;;  %v2718_v16 = vmax.f32 %v2676_v1, 0.0 }
 0x45d   : > { %v2682_v15 = vadd.f32 %v2681_v14, %v4962_v40  ;;  %v2719_v19 = vmax.f32 %v2678_v42, 0.0  ;;  %v3071_v42 = vsub.s32 6, %v4753_v34  ;;  %v2781_v9 = vrot.slane %v4759_v36, %v2780_v5 }
 0x45e   : > { %v2720_v18 = vmax.f32 %v2680_v10, 0.0 }
 0x45f   : > { %v2721_v24 = vmax.f32 %v2682_v15, 0.0  ;;  %v3072_v10 = vrot.slane %v4759_v36, %v3071_v42  ;;  %v5008_v15 = vrot.slane %v2781_v9, %v4952_v7 }
 0x460   : > { %v2738_v28 = vpack.c.bf16 %v2720_v18, %v2718_v16 }
 0x461   : > { %v2739_v29 = vpack.c.bf16 %v2721_v24, %v2719_v19  ;;  %v2685_v30 = vpop.f32.mrb[60].mxu1  ;;  %v5014_v18 = vrot.slane %v3072_v10, %v4907_v0 }
 0x462   : > { %v2686_v6 = vadd.f32 %v2685_v30, %v4959_v35  ;;  %v2687_v31 = vpop.f32.mrb[61].mxu1 }
 0x463   : > { %v2688_v32 = vadd.f32 %v2687_v31, %v4962_v40  ;;  %v2689_v33 = vpop.f32.mrb[62].mxu1  ;;  %3044 = vmatprep.mubr.bf16.mxu1 %v2739_v29 }
 0x464   : > { %v2690_v37 = vadd.f32 %v2689_v33, %v4959_v35  ;;  %v2691_v53 = vpop.f32.mrb[63].mxu1  ;;  %3045 = vmatmul.mubr.bf16.gmra.mrb[88].mxu1 %v2738_v28  ;;  %v2722_v55 = vmax.f32 %v2686_v6, 0.0  ;;  %v2777_v35 = vrot.slane %v4759_v36, %v4952_v7 }
 0x465   : > { %v2692_v54 = vadd.f32 %v2691_v53, %v4962_v40  ;;  %v2723_v57 = vmax.f32 %v2688_v32, 0.0  ;;  %v3068_v40 = vrot.slane %v4759_v36, %v4907_v0 }
 0x466   : > { %v2724_v56 = vmax.f32 %v2690_v37, 0.0  ;;  %v5005_v14 = vrot.slane %v2777_v35, %v4952_v7 }
 0x467   : > { %v2725_v59 = vmax.f32 %v2692_v54, 0.0  ;;  %v5011_v16 = vrot.slane %v3068_v40, %v4907_v0 }
 0x468   : > { %v2740_v41 = vpack.c.bf16 %v2724_v56, %v2722_v55 }
 0x469   : > { %v2741_v1 = vpack.c.bf16 %v2725_v59, %v2723_v57 }
 0x46b   : > { %3054 = vmatprep.mubr.bf16.mxu1 %v2741_v1 }
 0x46c   : > { %3055 = vmatmul.mubr.bf16.gmra.mrb[92].mxu1 %v2740_v41 }
 0x507   : > { %v2986_v34 = vpop.f32.mrb[64].mxu1 }
 0x508   : > { %v2987_v19 = vadd.f32 %v2986_v34, %v5005_v14  ;;  %v2988_v24 = vpop.f32.mrb[65].mxu1 }
 0x509   : > { %v2989_v28 = vadd.f32 %v2988_v24, %v5008_v15  ;;  %v2990_v36 = vpop.f32.mrb[66].mxu1 }
 0x50a   : > { %v3083_v29 = vmul.f32 %v5011_v16, %v2987_v19  ;;  %v2991_v30 = vadd.f32 %v2990_v36, %v5005_v14  ;;  %v2992_v7 = vpop.f32.mrb[67].mxu1 }
 0x50b   : > { %v3084_v6 = vmul.f32 %v5014_v18, %v2989_v28  ;;  %v2993_v31 = vadd.f32 %v2992_v7, %v5008_v15 }
 0x50c   : > { %v3115_v32 = vadd.f32 %v4783_v49, %v3083_v29  ;;  %v3085_v0 = vmul.f32 %v5011_v16, %v2991_v30 }
 0x50d   : > { %v3116_v33 = vadd.f32 %v4777_v47, %v3084_v6  ;;  %v3086_v37 = vmul.f32 %v5014_v18, %v2993_v31 }
 0x50e   : > { %3147 = vst [vmem:[%s5027_s14] sm:$0xff] %v3115_v32  ;;  %v3117_v53 = vadd.f32 %v4774_v45, %v3085_v0 }
 0x50f   : > { %3148 = vst [vmem:[%s5027_s14 + $0x8] sm:$0xff] %v3116_v33  ;;  %v3118_v54 = vadd.f32 %v4780_v48, %v3086_v37  ;;  %v2996_v55 = vpop.f32.mrb[68].mxu1 }
 0x510   : > { %3149 = vst [vmem:[%s5027_s14 + $0x10] sm:$0xff] %v3117_v53  ;;  %v2997_v49 = vadd.f32 %v2996_v55, %v5005_v14  ;;  %v2998_v47 = vpop.f32.mrb[69].mxu1 }
 0x511   : > { %3150 = vst [vmem:[%s5027_s14 + $0x18] sm:$0xff] %v3118_v54  ;;  %v2999_v56 = vadd.f32 %v2998_v47, %v5008_v15  ;;  %v3000_v57 = vpop.f32.mrb[70].mxu1 }
 0x512   : > { %v3087_v59 = vmul.f32 %v5011_v16, %v2997_v49  ;;  %v3001_v41 = vadd.f32 %v3000_v57, %v5005_v14  ;;  %v3002_v45 = vpop.f32.mrb[71].mxu1 }
 0x513   : > { %v3088_v48 = vmul.f32 %v5014_v18, %v2999_v56  ;;  %v3003_v1 = vadd.f32 %v3002_v45, %v5008_v15 }
 0x514   : > { %v3119_v5 = vadd.f32 %v4799_v63, %v3087_v59  ;;  %v3089_v42 = vmul.f32 %v5011_v16, %v3001_v41 }
 0x515   : > { %v3120_v35 = vadd.f32 %v4793_v61, %v3088_v48  ;;  %v3090_v9 = vmul.f32 %v5014_v18, %v3003_v1 }
 0x516   : > { %3151 = vst [vmem:[%s5027_s14 + $0x20] sm:$0xff] %v3119_v5  ;;  %v3121_v40 = vadd.f32 %v4790_v58, %v3089_v42 }
 0x517   : > { %3152 = vst [vmem:[%s5027_s14 + $0x28] sm:$0xff] %v3120_v35  ;;  %v3122_v10 = vadd.f32 %v4796_v62, %v3090_v9  ;;  %v3006_v34 = vpop.f32.mrb[72].mxu1 }
 0x518   : > { %3153 = vst [vmem:[%s5027_s14 + $0x30] sm:$0xff] %v3121_v40  ;;  %v3007_v19 = vadd.f32 %v3006_v34, %v5005_v14  ;;  %v3008_v24 = vpop.f32.mrb[73].mxu1 }
 0x519   : > { %3154 = vst [vmem:[%s5027_s14 + $0x38] sm:$0xff] %v3122_v10  ;;  %v3009_v63 = vadd.f32 %v3008_v24, %v5008_v15  ;;  %v3010_v61 = vpop.f32.mrb[74].mxu1 }
 0x51a   : > { %v3091_v28 = vmul.f32 %v5011_v16, %v3007_v19  ;;  %v3011_v36 = vadd.f32 %v3010_v61, %v5005_v14  ;;  %v3012_v58 = vpop.f32.mrb[75].mxu1 }
 0x51b   : > { %v3092_v62 = vmul.f32 %v5014_v18, %v3009_v63  ;;  %v3013_v29 = vadd.f32 %v3012_v58, %v5008_v15 }
 0x51c   : > { %v3123_v30 = vadd.f32 %v4815_v13, %v3091_v28  ;;  %v3093_v7 = vmul.f32 %v5011_v16, %v3011_v36 }
 0x51d   : > { %v3124_v6 = vadd.f32 %v4809_v11, %v3092_v62  ;;  %v3094_v31 = vmul.f32 %v5014_v18, %v3013_v29 }
 0x51e   : > { %3155 = vst [vmem:[%s5027_s14 + $0x40] sm:$0xff] %v3123_v30  ;;  %v3125_v32 = vadd.f32 %v4806_v8, %v3093_v7 }
 0x51f   : > { %3156 = vst [vmem:[%s5027_s14 + $0x48] sm:$0xff] %v3124_v6  ;;  %v3126_v0 = vadd.f32 %v4812_v12, %v3094_v31  ;;  %v3016_v33 = vpop.f32.mrb[76].mxu1 }
 0x520   : > { %3157 = vst [vmem:[%s5027_s14 + $0x50] sm:$0xff] %v3125_v32  ;;  %v3017_v37 = vadd.f32 %v3016_v33, %v5005_v14  ;;  %v3018_v53 = vpop.f32.mrb[77].mxu1 }
 0x521   : > { %3158 = vst [vmem:[%s5027_s14 + $0x58] sm:$0xff] %v3126_v0  ;;  %v3019_v13 = vadd.f32 %v3018_v53, %v5008_v15  ;;  %v3020_v11 = vpop.f32.mrb[78].mxu1 }
 0x522   : > { %v3095_v54 = vmul.f32 %v5011_v16, %v3017_v37  ;;  %v3021_v55 = vadd.f32 %v3020_v11, %v5005_v14  ;;  %v3022_v8 = vpop.f32.mrb[79].mxu1 }
 0x523   : > { %v3096_v12 = vmul.f32 %v5014_v18, %v3019_v13  ;;  %v3023_v49 = vadd.f32 %v3022_v8, %v5008_v15 }
 0x524   : > { %v3127_v47 = vadd.f32 %v4831_v27, %v3095_v54  ;;  %v3097_v56 = vmul.f32 %v5011_v16, %v3021_v55 }
 0x525   : > { %v3128_v57 = vadd.f32 %v4825_v25, %v3096_v12  ;;  %v3098_v59 = vmul.f32 %v5014_v18, %v3023_v49 }
 0x526   : > { %3159 = vst [vmem:[%s5027_s14 + $0x60] sm:$0xff] %v3127_v47  ;;  %v3129_v41 = vadd.f32 %v4822_v22, %v3097_v56 }
 0x527   : > { %3160 = vst [vmem:[%s5027_s14 + $0x68] sm:$0xff] %v3128_v57  ;;  %v3130_v45 = vadd.f32 %v4828_v26, %v3098_v59  ;;  %v3026_v48 = vpop.f32.mrb[80].mxu1 }
 0x528   : > { %3161 = vst [vmem:[%s5027_s14 + $0x70] sm:$0xff] %v3129_v41  ;;  %v3027_v1 = vadd.f32 %v3026_v48, %v5005_v14  ;;  %v3028_v5 = vpop.f32.mrb[81].mxu1 }
 0x529   : > { %3162 = vst [vmem:[%s5027_s14 + $0x78] sm:$0xff] %v3130_v45  ;;  %v3029_v27 = vadd.f32 %v3028_v5, %v5008_v15  ;;  %v3030_v25 = vpop.f32.mrb[82].mxu1 }
 0x52a   : > { %v3099_v42 = vmul.f32 %v5011_v16, %v3027_v1  ;;  %v3031_v35 = vadd.f32 %v3030_v25, %v5005_v14  ;;  %v3032_v22 = vpop.f32.mrb[83].mxu1 }
 0x52b   : > { %v3100_v26 = vmul.f32 %v5014_v18, %v3029_v27  ;;  %v3033_v9 = vadd.f32 %v3032_v22, %v5008_v15 }
 0x52c   : > { %v3131_v40 = vadd.f32 %v4847_v50, %v3099_v42  ;;  %v3101_v10 = vmul.f32 %v5011_v16, %v3031_v35 }
 0x52d   : > { %v3132_v34 = vadd.f32 %v4841_v44, %v3100_v26  ;;  %v3102_v19 = vmul.f32 %v5014_v18, %v3033_v9 }
 0x52e   : > { %3163 = vst [vmem:[%s5027_s14 + $0x80] sm:$0xff] %v3131_v40  ;;  %v3133_v24 = vadd.f32 %v4838_v39, %v3101_v10 }
 0x52f   : > { %3164 = vst [vmem:[%s5027_s14 + $0x88] sm:$0xff] %v3132_v34  ;;  %v3134_v63 = vadd.f32 %v4844_v46, %v3102_v19  ;;  %v3036_v61 = vpop.f32.mrb[84].mxu1 }
 0x530   : > { %3165 = vst [vmem:[%s5027_s14 + $0x90] sm:$0xff] %v3133_v24  ;;  %v3037_v28 = vadd.f32 %v3036_v61, %v5005_v14  ;;  %v3038_v36 = vpop.f32.mrb[85].mxu1 }
 0x531   : > { %3166 = vst [vmem:[%s5027_s14 + $0x98] sm:$0xff] %v3134_v63  ;;  %v3039_v50 = vadd.f32 %v3038_v36, %v5008_v15  ;;  %v3040_v44 = vpop.f32.mrb[86].mxu1 }
 0x532   : > { %v3103_v58 = vmul.f32 %v5011_v16, %v3037_v28  ;;  %v3041_v62 = vadd.f32 %v3040_v44, %v5005_v14  ;;  %v3042_v39 = vpop.f32.mrb[87].mxu1 }
 0x533   : > { %v3104_v46 = vmul.f32 %v5014_v18, %v3039_v50  ;;  %v3043_v29 = vadd.f32 %v3042_v39, %v5008_v15 }
 0x534   : > { %v3135_v30 = vadd.f32 %v4863_v4, %v3103_v58  ;;  %v3105_v7 = vmul.f32 %v5011_v16, %v3041_v62 }
 0x535   : > { %v3136_v6 = vadd.f32 %v4857_v2, %v3104_v46  ;;  %v3106_v31 = vmul.f32 %v5014_v18, %v3043_v29 }
 0x536   : > { %3167 = vst [vmem:[%s5027_s14 + $0xa0] sm:$0xff] %v3135_v30  ;;  %v3137_v32 = vadd.f32 %v4854_v60, %v3105_v7 }
 0x537   : > { %3168 = vst [vmem:[%s5027_s14 + $0xa8] sm:$0xff] %v3136_v6  ;;  %v3138_v0 = vadd.f32 %v4860_v3, %v3106_v31  ;;  %v3046_v33 = vpop.f32.mrb[88].mxu1 }
 0x538   : > { %3169 = vst [vmem:[%s5027_s14 + $0xb0] sm:$0xff] %v3137_v32  ;;  %v3047_v37 = vadd.f32 %v3046_v33, %v5005_v14  ;;  %v3048_v53 = vpop.f32.mrb[89].mxu1 }
 0x539   : > { %3170 = vst [vmem:[%s5027_s14 + $0xb8] sm:$0xff] %v3138_v0  ;;  %v3049_v4 = vadd.f32 %v3048_v53, %v5008_v15  ;;  %v3050_v2 = vpop.f32.mrb[90].mxu1 }
 0x53a   : > { %v3107_v13 = vmul.f32 %v5011_v16, %v3047_v37  ;;  %v3051_v11 = vadd.f32 %v3050_v2, %v5005_v14  ;;  %v3052_v60 = vpop.f32.mrb[91].mxu1 }
 0x53b   : > { %v3108_v3 = vmul.f32 %v5014_v18, %v3049_v4  ;;  %v3053_v54 = vadd.f32 %v3052_v60, %v5008_v15 }
 0x53c   : > { %v3139_v55 = vadd.f32 %v4879_v23, %v3107_v13  ;;  %v3109_v8 = vmul.f32 %v5011_v16, %v3051_v11 }
 0x53d   : > { %v3140_v12 = vadd.f32 %v4873_v20, %v3108_v3  ;;  %v3110_v49 = vmul.f32 %v5014_v18, %v3053_v54 }
 0x53e   : > { %3171 = vst [vmem:[%s5027_s14 + $0xc0] sm:$0xff] %v3139_v55  ;;  %v3141_v47 = vadd.f32 %v4870_v17, %v3109_v8 }
 0x53f   : > { %3172 = vst [vmem:[%s5027_s14 + $0xc8] sm:$0xff] %v3140_v12  ;;  %v3142_v56 = vadd.f32 %v4876_v21, %v3110_v49  ;;  %v3056_v57 = vpop.f32.mrb[92].mxu1 }
 0x540   : > { %3173 = vst [vmem:[%s5027_s14 + $0xd0] sm:$0xff] %v3141_v47  ;;  %v3057_v59 = vadd.f32 %v3056_v57, %v5005_v14  ;;  %v3058_v23 = vpop.f32.mrb[93].mxu1 }
 0x541   : > { %3174 = vst [vmem:[%s5027_s14 + $0xd8] sm:$0xff] %v3142_v56  ;;  %v3059_v41 = vadd.f32 %v3058_v23, %v5008_v15  ;;  %v3060_v20 = vpop.f32.mrb[94].mxu1 }
 0x542   : > { %v3111_v45 = vmul.f32 %v5011_v16, %v3057_v59  ;;  %v3061_v48 = vadd.f32 %v3060_v20, %v5005_v14  ;;  %v3062_v17 = vpop.f32.mrb[95].mxu1 }
 0x543   : > { %v3112_v21 = vmul.f32 %v5014_v18, %v3059_v41  ;;  %v3063_v1 = vadd.f32 %v3062_v17, %v5008_v15 }
 0x544   : > { %v3143_v5 = vadd.f32 %v4895_v52, %v3111_v45  ;;  %v3113_v27 = vmul.f32 %v5011_v16, %v3061_v48 }
 0x545   : > { %v3144_v25 = vadd.f32 %v4889_v43, %v3112_v21  ;;  %v3114_v42 = vmul.f32 %v5014_v18, %v3063_v1 }
 0x546   : > { %3175 = vst [vmem:[%s5027_s14 + $0xe0] sm:$0xff] %v3143_v5  ;;  %v3145_v14 = vadd.f32 %v4886_v38, %v3113_v27 }
 0x547   : > { %3176 = vst [vmem:[%s5027_s14 + $0xe8] sm:$0xff] %v3144_v25  ;;  %v3146_v52 = vadd.f32 %v4892_v51, %v3114_v42 }
 0x548   : > { %3177 = vst [vmem:[%s5027_s14 + $0xf0] sm:$0xff] %v3145_v14 }
 0x549   : > { %3178 = vst [vmem:[%s5027_s14 + $0xf8] sm:$0xff] %v3146_v52 }
 0x54a   : > { %4333 = shalt.err (!%p4330_p13)
}
 0x54b   : > { %s4334_s9 = scalar_lea.hbm %s5148_s17, 4096  ;;  %s4338_s16 = scalar_lea.hbm %s5205_s7, 8192 }
 0x54c   : > { %p4335_p9 = scmp.ne.s32.totalorder %s5148_s17, %s4334_s9  ;;  %p4339_p4 = scmp.lt.u32.totalorder %s5148_s17, %s5205_s7 }
 0x54d   : > { %p4340_p8 = scmp.lt.u32.totalorder %s4338_s16, %s4334_s9  ;;  %p4342_p3 = scmp.lt.u32.totalorder %s4334_s9, %s5148_s17 }
 0x54e   : > { %p4336_p0 = pnand %p4335_p9, %p4619_p10 }
 0x54f   : > { %p4341_p6 = por %p4340_p8, %p4339_p4 }
 0x550   : > { %p4337_p11 = pneg %p4336_p0 }
 0x551   : > { %p4343_p5 = por %p4342_p3, %p4341_p6 }
 0x553   : > { %p4344_p7 = pnand %p4343_p5, %p4337_p11 }
 0x555   : > { %4347 = shalt.err (!%p4344_p7)
}
 0x556   : > { %s4406_s12 = smov 256   ;;  %s4407_s8 = smov 16  }
 0x557   : > { %3767 = dma.vmem_to_hbm [thread:$0]  (%p4619_p10), %s5150_s10, 4096, %s5148_s17, %s3180_s28, %s4406_s12, %s4406_s12, %s4407_s8  }
 0x558 PF: > { %s5225_s13 = sld [smem:[#allocation16_spill]]  ;;  %s3209_s15 = sand.u32 1, %s4382_s24  }
 0x559   : > { %p5227_p1 = scmp.ge.s32.totalorder %s4394_s27, 2  ;;  %s3210_s21 = scalar_lea.sflag [#allocation4], %s3209_s15 }
 0x55e   : > { %p5226_p12 = scmp.ne.s32.totalorder %s5225_s13, 0 }
 0x560   : > { %p3787_p2 = pnand %p5227_p1, %p5226_p12 }
 0x562   : > { %4377 = dma.done.wait (!%p3787_p2), %s3210_s21, 4096  }
 0x563   : > { %4379 = vsyncadd (!%p3787_p2), %s3210_s21, 4294963200  ;;  %p22_p13 = scmp.ge.s32.totalorder %s4609_s22, 4   ;;  %s5228_s24 = smov %s4386_s25 }
 0x564   : > { %s5229_s25 = smov %s4390_s26  ;;  %s5230_s26 = smov %s4625_s20 }
 0x565   : > { %s5231_s27 = smov %s4609_s22  ;;  %24 = sbr.rel (!%p22_p13) target bundleno = 7 (0x7), region = 109 }
 0x56c   :  { %3215 = vsyncpa [#allocation3], 1 }
 0x56d   :  { %3217 = vsyncpa [#allocation3 + $0x1], 1 }
 0x56e   :  { %3218 = vsyncpa [#allocation6], 1 }
 0x56f   :  { %3219 = vsyncpa [#allocation9], 1 }
 0x570   :  { %3220 = vsyncpa [#allocation4], 1 }
 0x571   :  { %3222 = vsyncpa [#allocation4 + $0x1], 1 }

</bundles_post_ra>
